<compile_context>
chip_gen: v7x
topology: tpu7x:2x2x1
jax: 0.10.0
libtpu: 0.0.40
codegen_flags: <defaults>
</compile_context>

<pallas_src>
import math

import jax
import jax.numpy as jnp
from jax import lax
from jax.experimental import pallas as pl
from jax.experimental.pallas import tpu as pltpu


# ---------------------------------------------------------------------------
# Pallas kernel: fused 3x3 conv (stride 1) + BN(eval, folded) + ReLU
# ---------------------------------------------------------------------------
def conv3x3_bn_relu_kernel(x2_ref, x1_ref, w_ref, shift_ref, o_ref,
                           xpad_ref, patch_ref):
    """
    x2_ref:    (1, H, W, C2)     skip-connection features (first half of torch cat)
    x1_ref:    (1, H, W, C1)     upsampled features       (second half of torch cat)
    w_ref:     (9*Cin, Cout)     conv weights, (kh,kw,cin)-major rows, BN scale folded in
    shift_ref: (1, Cout)         beta + (conv_bias - running_mean) * scale
    o_ref:     (1, H, W, Cout)
    xpad_ref:  (H+2, W+2, Cin)   VMEM scratch: zero-padded, channel-concatenated input
    patch_ref: (H*W, 9*Cin)      VMEM scratch: im2col patch matrix
    """
    H, W, C2 = x2_ref.shape[1], x2_ref.shape[2], x2_ref.shape[3]
    C1 = x1_ref.shape[3]
    Cin = C2 + C1
    Cout = o_ref.shape[3]

    # Zero-pad halo + channel concat in VMEM (replaces HBM-side jnp.pad + concatenate).
    # Re-zeroed every grid step: scratch is per-core and the grid axis is "parallel".
    xpad_ref[...] = jnp.zeros_like(xpad_ref)
    xpad_ref[1:H + 1, 1:W + 1, 0:C2] = x2_ref[0]
    xpad_ref[1:H + 1, 1:W + 1, C2:Cin] = x1_ref[0]

    # im2col: column block t = kh*3 + kw of the patch matrix holds that tap's channels.
    for kh in range(3):
        for kw in range(3):
            t = kh * 3 + kw
            tap = xpad_ref[kh:kh + H, kw:kw + W, :]            # (H, W, Cin)
            patch_ref[:, t * Cin:(t + 1) * Cin] = tap.reshape(H * W, Cin)

    # Single MXU matmul with K = 9*Cin (previously 9 separate K=Cin matmuls).
    acc = jnp.dot(patch_ref[...], w_ref[...], preferred_element_type=jnp.float32)
    y = jnp.maximum(acc + shift_ref[0], 0.0)                   # conv bias + BN + ReLU
    # NOTE: Cout is tiny in this toy config, so this store is lane-masked; at real
    # APSnet widths (Cout >= 64/128) it is lane-dense automatically.  Folding W into
    # the lane dim would require a minor-dim-changing reshape Mosaic may not lower,
    # so the safe (H, W, Cout) layout is kept.
    o_ref[0] = y.reshape(H, W, Cout).astype(o_ref.dtype)


def conv3x3_bn_relu(x2_nhwc, x1_nhwc, w2d, shift):
    """Fused conv3x3 + BN(eval) + ReLU over cat([x2, x1], channel).

    x2_nhwc: (N, H, W, C2), x1_nhwc: (N, H, W, C1) -> (N, H, W, Cout)."""
    N, H, W, C2 = x2_nhwc.shape
    C1 = x1_nhwc.shape[-1]
    Cin = C2 + C1
    Cout = w2d.shape[-1]
    assert w2d.shape[0] == 9 * Cin

    itemsize = x2_nhwc.dtype.itemsize
    flops = 2 * N * H * W * 9 * Cin * Cout
    bytes_accessed = ((N * H * W * Cin + N * H * W * Cout) * itemsize
                      + (w2d.size + shift.size) * 4)

    # TODO(synk): for large feature maps, tile H (grid=(N, H//TH)) with a 2-row halo so
    #             double-buffered blocks fit v7x's 64 MiB VMEM; full-image per-batch
    #             blocks are fine at these sizes.  On v6e/v7x, feeding bf16 activations
    #             and weights (keeping the f32 accumulator) would halve HBM bytes.
    return pl.pallas_call(
        conv3x3_bn_relu_kernel,
        out_shape=jax.ShapeDtypeStruct((N, H, W, Cout), x2_nhwc.dtype),
        grid=(N,),
        in_specs=[
            pl.BlockSpec((1, H, W, C2), lambda n: (n, 0, 0, 0)),
            pl.BlockSpec((1, H, W, C1), lambda n: (n, 0, 0, 0)),
            pl.BlockSpec((9 * Cin, Cout), lambda n: (0, 0)),
            pl.BlockSpec((1, Cout), lambda n: (0, 0)),
        ],
        out_specs=pl.BlockSpec((1, H, W, Cout), lambda n: (n, 0, 0, 0)),
        scratch_shapes=[
            pltpu.VMEM((H + 2, W + 2, Cin), x2_nhwc.dtype),
            pltpu.VMEM((H * W, 9 * Cin), x2_nhwc.dtype),
        ],
        compiler_params=pltpu.CompilerParams(
            dimension_semantics=("parallel",),
            # above the 16/32 MiB scoped defaults (v5e / v6e,v7x), below v7x's 64 MiB.
            vmem_limit_bytes=48 * 1024 * 1024),
        cost_estimate=pl.CostEstimate(flops=flops, transcendentals=0,
                                      bytes_accessed=bytes_accessed),
    )(x2_nhwc, x1_nhwc, w2d, shift)


# ---------------------------------------------------------------------------
# JAX glue: bilinear upsample (align_corners=True), torch-style F.pad (or crop)
# ---------------------------------------------------------------------------
def bilinear_upsample_align_corners(x_nhwc, scale):
    """nn.Upsample(scale_factor=scale, mode='bilinear', align_corners=True) in NHWC."""
    N, H, W, C = x_nhwc.shape
    Ho, Wo = H * scale, W * scale

    def coords(n_in, n_out):
        if n_out == 1 or n_in == 1:
            src = jnp.zeros((n_out,), jnp.float32)
        else:
            src = jnp.arange(n_out, dtype=jnp.float32) * (n_in - 1) / (n_out - 1)
        i0 = jnp.clip(jnp.floor(src).astype(jnp.int32), 0, n_in - 1)
        i1 = jnp.clip(i0 + 1, 0, n_in - 1)
        frac = src - i0.astype(jnp.float32)
        return i0, i1, frac

    h0, h1, fh = coords(H, Ho)
    w0, w1, fw = coords(W, Wo)
    top = (x_nhwc[:, h0, :, :] * (1.0 - fh)[None, :, None, None]
           + x_nhwc[:, h1, :, :] * fh[None, :, None, None])
    out = (top[:, :, w0, :] * (1.0 - fw)[None, None, :, None]
           + top[:, :, w1, :] * fw[None, None, :, None])
    return out.astype(x_nhwc.dtype)


def torch_like_pad(x_nhwc, diffX, diffY):
    """F.pad(x1, (diffY//2, ceil(diffY/2), diffX//2, ceil(diffX/2))) in NHWC.

    In APSnet, diffX is the H difference (torch dim 2) and diffY the W difference
    (torch dim 3); torch applies diffY to the last dim (W) and diffX to H, which is
    what is done here.  Negative diffs crop, matching F.pad semantics."""
    def pad_or_crop(x, axis, lo, hi):
        size = x.shape[axis]
        x = lax.slice_in_dim(x, max(0, -lo), size - max(0, -hi), axis=axis)
        cfg = [(0, 0)] * x.ndim
        cfg[axis] = (max(0, lo), max(0, hi))
        return jnp.pad(x, cfg)

    x = pad_or_crop(x_nhwc, 1, diffX // 2, math.ceil(diffX / 2))
    x = pad_or_crop(x, 2, diffY // 2, math.ceil(diffY / 2))
    return x


# ---------------------------------------------------------------------------
# Parameters (deterministic, synthetic) and the module forward
# ---------------------------------------------------------------------------
def init_up_params(key, in_ch, out_ch, eps=1e-5):
    kw_, kb, kg, kbt, km, kv = jax.random.split(key, 6)
    w_hwio = 0.1 * jax.random.normal(kw_, (3, 3, in_ch, out_ch), jnp.float32)
    bias = 0.1 * jax.random.normal(kb, (out_ch,), jnp.float32)
    gamma = 1.0 + 0.1 * jax.random.normal(kg, (out_ch,), jnp.float32)
    beta = 0.1 * jax.random.normal(kbt, (out_ch,), jnp.float32)
    run_mean = 0.1 * jax.random.normal(km, (out_ch,), jnp.float32)
    run_var = 0.5 + jnp.abs(jax.random.normal(kv, (out_ch,), jnp.float32))

    # Fold BN(eval) scale and the conv bias into the weights / a single additive shift.
    scale = gamma / jnp.sqrt(run_var + eps)
    shift = beta + (bias - run_mean) * scale
    w_folded = w_hwio * scale[None, None, None, :]
    return {
        # raw params (used by the pure-JAX reference)
        "w_hwio": w_hwio, "bias": bias, "gamma": gamma, "beta": beta,
        "run_mean": run_mean, "run_var": run_var, "eps": eps,
        # kernel params
        "w2d": w_folded.reshape(9 * in_ch, out_ch),   # (kh,kw,cin)-major rows
        "shift": shift.reshape(1, out_ch),
    }


def up_forward(params, x1_nchw, x2_nchw, scale=2):
    x1 = jnp.transpose(x1_nchw, (0, 2, 3, 1))   # NCHW -> NHWC
    x2 = jnp.transpose(x2_nchw, (0, 2, 3, 1))

    x1 = bilinear_upsample_align_corners(x1, scale)
    diffX = x2.shape[1] - x1.shape[1]           # torch dim 2 (H)
    diffY = x2.shape[2] - x1.shape[2]           # torch dim 3 (W)
    x1 = torch_like_pad(x1, diffX, diffY)

    # No HBM concat / halo pad here: the Pallas kernel does both in VMEM.
    y = conv3x3_bn_relu(x2, x1, params["w2d"], params["shift"])
    # Dropout: identity (eval mode).
    return jnp.transpose(y, (0, 3, 1, 2))       # NHWC -> NCHW


# ---------------------------------------------------------------------------
# Pure-JAX reference of the full forward (unfolded conv + BN + ReLU)
# ---------------------------------------------------------------------------
def reference_up_forward(params, x1_nchw, x2_nchw, scale=2):
    x1 = jnp.transpose(x1_nchw, (0, 2, 3, 1))
    x2 = jnp.transpose(x2_nchw, (0, 2, 3, 1))
    x1 = bilinear_upsample_align_corners(x1, scale)
    diffX = x2.shape[1] - x1.shape[1]
    diffY = x2.shape[2] - x1.shape[2]
    x1 = torch_like_pad(x1, diffX, diffY)
    x = jnp.concatenate([x2, x1], axis=-1)      # torch.cat([x2, x1], dim=1)
    y = lax.conv_general_dilated(
        x, params["w_hwio"], window_strides=(1, 1), padding=((1, 1), (1, 1)),
        dimension_numbers=("NHWC", "HWIO", "NHWC")) + params["bias"]
    y = ((y - params["run_mean"])
         * (params["gamma"] / jnp.sqrt(params["run_var"] + params["eps"]))
         + params["beta"])
    y = jnp.maximum(y, 0.0)
    return jnp.transpose(y, (0, 3, 1, 2))


if __name__ == "__main__":
    key = jax.random.PRNGKey(0)
    k1, k2, kp = jax.random.split(key, 3)

    N, in_ch, out_ch = 2, 8, 4
    H2, W2 = 16, 16
    # x1: low-resolution decoder features (in_ch//2 channels, half spatial size)
    # x2: encoder skip connection (in_ch//2 channels, full spatial size)
    x1 = jax.random.normal(k1, (N, in_ch // 2, H2 // 2, W2 // 2), jnp.float32)
    x2 = jax.random.normal(k2, (N, in_ch // 2, H2, W2), jnp.float32)

    params = init_up_params(kp, in_ch, out_ch)

    out = jax.block_until_ready(jax.jit(up_forward)(params, x1, x2))
    assert out.shape == (N, out_ch, H2, W2), out.shape

    # correctness check of the fused Pallas path against a pure-JAX reference
    ref = reference_up_forward(params, x1, x2)
    err = float(jnp.max(jnp.abs(out - ref)))
    assert jnp.allclose(out, ref, rtol=1e-4, atol=1e-4), err

    print("KERNEL_OK")
</pallas_src>

<mosaic_0001>
module attributes {stable_mosaic.version = 11 : i64} {
  func.func @conv3x3_bn_relu_kernel(%arg0: i32, %arg1: memref<1x16x16x4xf32, #tpu.memory_space<vmem>>, %arg2: memref<1x16x16x4xf32, #tpu.memory_space<vmem>>, %arg3: memref<72x4xf32, #tpu.memory_space<vmem>>, %arg4: memref<1x4xf32, #tpu.memory_space<vmem>>, %arg5: memref<1x16x16x4xf32, #tpu.memory_space<vmem>>, %arg6: memref<18x18x8xf32, #tpu.memory_space<vmem>>, %arg7: memref<256x72xf32, #tpu.memory_space<vmem>>) attributes {dimension_semantics = [#tpu.dimension_semantics<parallel>], iteration_bounds = array<i64: 2>, scalar_prefetch = 0 : i64, scratch_operands = 2 : i64, tpu.core_type = #tpu.core_type<tc>, window_params = [{transform_indices = @transform_0, window_bounds = array<i64: 1, 16, 16, 4>}, {transform_indices = @transform_1, window_bounds = array<i64: 1, 16, 16, 4>}, {pipeline_mode = #tpu.pipeline_mode<synchronous>, transform_indices = @transform_2, window_bounds = array<i64: 72, 4>}, {pipeline_mode = #tpu.pipeline_mode<synchronous>, transform_indices = @transform_3, window_bounds = array<i64: 1, 4>}, {transform_indices = @transform_4, window_bounds = array<i64: 1, 16, 16, 4>}]} {
    %cst = arith.constant 0.000000e+00 : f32
    %0 = vector.broadcast %cst : f32 to vector<18x18x8xf32>
    %c0 = arith.constant 0 : index
    %c0_0 = arith.constant 0 : index
    %c0_1 = arith.constant 0 : index
    %1 = vector.load %arg6[%c0, %c0_0, %c0_1] : memref<18x18x8xf32, #tpu.memory_space<vmem>>, vector<18x18x8xf32>
    tpu.vector_store %arg6[%c0, %c0_0, %c0_1], %0 {strides = array<i32>} : memref<18x18x8xf32, #tpu.memory_space<vmem>>, vector<18x18x8xf32>,
    %c0_2 = arith.constant 0 : index
    %c0_3 = arith.constant 0 : index
    %c0_4 = arith.constant 0 : index
    %c0_5 = arith.constant 0 : index
    %2 = vector.load %arg1[%c0_2, %c0_3, %c0_4, %c0_5] : memref<1x16x16x4xf32, #tpu.memory_space<vmem>>, vector<1x16x16x4xf32>
    %3 = vector.shape_cast %2 : vector<1x16x16x4xf32> to vector<16x16x4xf32>
    %c1 = arith.constant 1 : index
    %c1_6 = arith.constant 1 : index
    %c0_7 = arith.constant 0 : index
    %4 = vector.load %arg6[%c1, %c1_6, %c0_7] : memref<18x18x8xf32, #tpu.memory_space<vmem>>, vector<16x16x4xf32>
    tpu.vector_store %arg6[%c1, %c1_6, %c0_7], %3 {strides = array<i32>} : memref<18x18x8xf32, #tpu.memory_space<vmem>>, vector<16x16x4xf32>,
    %c0_8 = arith.constant 0 : index
    %c0_9 = arith.constant 0 : index
    %c0_10 = arith.constant 0 : index
    %c0_11 = arith.constant 0 : index
    %5 = vector.load %arg2[%c0_8, %c0_9, %c0_10, %c0_11] : memref<1x16x16x4xf32, #tpu.memory_space<vmem>>, vector<1x16x16x4xf32>
    %6 = vector.shape_cast %5 : vector<1x16x16x4xf32> to vector<16x16x4xf32>
    %c1_12 = arith.constant 1 : index
    %c1_13 = arith.constant 1 : index
    %c4 = arith.constant 4 : index
    %7 = vector.load %arg6[%c1_12, %c1_13, %c4] : memref<18x18x8xf32, #tpu.memory_space<vmem>>, vector<16x16x4xf32>
    tpu.vector_store %arg6[%c1_12, %c1_13, %c4], %6 {strides = array<i32>} : memref<18x18x8xf32, #tpu.memory_space<vmem>>, vector<16x16x4xf32>,
    %c0_14 = arith.constant 0 : index
    %c0_15 = arith.constant 0 : index
    %c0_16 = arith.constant 0 : index
    %8 = vector.load %arg6[%c0_14, %c0_15, %c0_16] : memref<18x18x8xf32, #tpu.memory_space<vmem>>, vector<16x16x8xf32>
    %9 = vector.shape_cast %8 : vector<16x16x8xf32> to vector<256x8xf32>
    %c0_17 = arith.constant 0 : index
    %c0_18 = arith.constant 0 : index
    %10 = vector.load %arg7[%c0_17, %c0_18] : memref<256x72xf32, #tpu.memory_space<vmem>>, vector<256x8xf32>
    tpu.vector_store %arg7[%c0_17, %c0_18], %9 {strides = array<i32>} : memref<256x72xf32, #tpu.memory_space<vmem>>, vector<256x8xf32>,
    %c0_19 = arith.constant 0 : index
    %c1_20 = arith.constant 1 : index
    %c0_21 = arith.constant 0 : index
    %11 = vector.load %arg6[%c0_19, %c1_20, %c0_21] : memref<18x18x8xf32, #tpu.memory_space<vmem>>, vector<16x16x8xf32>
    %12 = vector.shape_cast %11 : vector<16x16x8xf32> to vector<256x8xf32>
    %c0_22 = arith.constant 0 : index
    %c8 = arith.constant 8 : index
    %13 = vector.load %arg7[%c0_22, %c8] : memref<256x72xf32, #tpu.memory_space<vmem>>, vector<256x8xf32>
    tpu.vector_store %arg7[%c0_22, %c8], %12 {strides = array<i32>} : memref<256x72xf32, #tpu.memory_space<vmem>>, vector<256x8xf32>,
    %c0_23 = arith.constant 0 : index
    %c2 = arith.constant 2 : index
    %c0_24 = arith.constant 0 : index
    %14 = vector.load %arg6[%c0_23, %c2, %c0_24] : memref<18x18x8xf32, #tpu.memory_space<vmem>>, vector<16x16x8xf32>
    %15 = vector.shape_cast %14 : vector<16x16x8xf32> to vector<256x8xf32>
    %c0_25 = arith.constant 0 : index
    %c16 = arith.constant 16 : index
    %16 = vector.load %arg7[%c0_25, %c16] : memref<256x72xf32, #tpu.memory_space<vmem>>, vector<256x8xf32>
    tpu.vector_store %arg7[%c0_25, %c16], %15 {strides = array<i32>} : memref<256x72xf32, #tpu.memory_space<vmem>>, vector<256x8xf32>,
    %c1_26 = arith.constant 1 : index
    %c0_27 = arith.constant 0 : index
    %c0_28 = arith.constant 0 : index
    %17 = vector.load %arg6[%c1_26, %c0_27, %c0_28] : memref<18x18x8xf32, #tpu.memory_space<vmem>>, vector<16x16x8xf32>
    %18 = vector.shape_cast %17 : vector<16x16x8xf32> to vector<256x8xf32>
    %c0_29 = arith.constant 0 : index
    %c24 = arith.constant 24 : index
    %19 = vector.load %arg7[%c0_29, %c24] : memref<256x72xf32, #tpu.memory_space<vmem>>, vector<256x8xf32>
    tpu.vector_store %arg7[%c0_29, %c24], %18 {strides = array<i32>} : memref<256x72xf32, #tpu.memory_space<vmem>>, vector<256x8xf32>,
    %c1_30 = arith.constant 1 : index
    %c1_31 = arith.constant 1 : index
    %c0_32 = arith.constant 0 : index
    %20 = vector.load %arg6[%c1_30, %c1_31, %c0_32] : memref<18x18x8xf32, #tpu.memory_space<vmem>>, vector<16x16x8xf32>
    %21 = vector.shape_cast %20 : vector<16x16x8xf32> to vector<256x8xf32>
    %c0_33 = arith.constant 0 : index
    %c32 = arith.constant 32 : index
    %22 = vector.load %arg7[%c0_33, %c32] : memref<256x72xf32, #tpu.memory_space<vmem>>, vector<256x8xf32>
    tpu.vector_store %arg7[%c0_33, %c32], %21 {strides = array<i32>} : memref<256x72xf32, #tpu.memory_space<vmem>>, vector<256x8xf32>,
    %c1_34 = arith.constant 1 : index
    %c2_35 = arith.constant 2 : index
    %c0_36 = arith.constant 0 : index
    %23 = vector.load %arg6[%c1_34, %c2_35, %c0_36] : memref<18x18x8xf32, #tpu.memory_space<vmem>>, vector<16x16x8xf32>
    %24 = vector.shape_cast %23 : vector<16x16x8xf32> to vector<256x8xf32>
    %c0_37 = arith.constant 0 : index
    %c40 = arith.constant 40 : index
    %25 = vector.load %arg7[%c0_37, %c40] : memref<256x72xf32, #tpu.memory_space<vmem>>, vector<256x8xf32>
    tpu.vector_store %arg7[%c0_37, %c40], %24 {strides = array<i32>} : memref<256x72xf32, #tpu.memory_space<vmem>>, vector<256x8xf32>,
    %c2_38 = arith.constant 2 : index
    %c0_39 = arith.constant 0 : index
    %c0_40 = arith.constant 0 : index
    %26 = vector.load %arg6[%c2_38, %c0_39, %c0_40] : memref<18x18x8xf32, #tpu.memory_space<vmem>>, vector<16x16x8xf32>
    %27 = vector.shape_cast %26 : vector<16x16x8xf32> to vector<256x8xf32>
    %c0_41 = arith.constant 0 : index
    %c48 = arith.constant 48 : index
    %28 = vector.load %arg7[%c0_41, %c48] : memref<256x72xf32, #tpu.memory_space<vmem>>, vector<256x8xf32>
    tpu.vector_store %arg7[%c0_41, %c48], %27 {strides = array<i32>} : memref<256x72xf32, #tpu.memory_space<vmem>>, vector<256x8xf32>,
    %c2_42 = arith.constant 2 : index
    %c1_43 = arith.constant 1 : index
    %c0_44 = arith.constant 0 : index
    %29 = vector.load %arg6[%c2_42, %c1_43, %c0_44] : memref<18x18x8xf32, #tpu.memory_space<vmem>>, vector<16x16x8xf32>
    %30 = vector.shape_cast %29 : vector<16x16x8xf32> to vector<256x8xf32>
    %c0_45 = arith.constant 0 : index
    %c56 = arith.constant 56 : index
    %31 = vector.load %arg7[%c0_45, %c56] : memref<256x72xf32, #tpu.memory_space<vmem>>, vector<256x8xf32>
    tpu.vector_store %arg7[%c0_45, %c56], %30 {strides = array<i32>} : memref<256x72xf32, #tpu.memory_space<vmem>>, vector<256x8xf32>,
    %c2_46 = arith.constant 2 : index
    %c2_47 = arith.constant 2 : index
    %c0_48 = arith.constant 0 : index
    %32 = vector.load %arg6[%c2_46, %c2_47, %c0_48] : memref<18x18x8xf32, #tpu.memory_space<vmem>>, vector<16x16x8xf32>
    %33 = vector.shape_cast %32 : vector<16x16x8xf32> to vector<256x8xf32>
    %c0_49 = arith.constant 0 : index
    %c64 = arith.constant 64 : index
    %34 = vector.load %arg7[%c0_49, %c64] : memref<256x72xf32, #tpu.memory_space<vmem>>, vector<256x8xf32>
    tpu.vector_store %arg7[%c0_49, %c64], %33 {strides = array<i32>} : memref<256x72xf32, #tpu.memory_space<vmem>>, vector<256x8xf32>,
    %c0_50 = arith.constant 0 : index
    %c0_51 = arith.constant 0 : index
    %35 = vector.load %arg7[%c0_50, %c0_51] : memref<256x72xf32, #tpu.memory_space<vmem>>, vector<256x72xf32>
    %c0_52 = arith.constant 0 : index
    %c0_53 = arith.constant 0 : index
    %36 = vector.load %arg3[%c0_52, %c0_53] : memref<72x4xf32, #tpu.memory_space<vmem>>, vector<72x4xf32>
    %cst_54 = arith.constant dense<0.000000e+00> : vector<256x4xf32>
    %37 = tpu.matmul %35, %36, %cst_54 {dimension_numbers = #tpu.dot_dimension_numbers<[1], [0], [0], [1], [0, 0, 1, 1], [], []>} : vector<256x72xf32>, vector<72x4xf32>, vector<256x4xf32> -> vector<256x4xf32>
    %c0_55 = arith.constant 0 : index
    %c0_56 = arith.constant 0 : index
    %38 = vector.load %arg4[%c0_55, %c0_56] : memref<1x4xf32, #tpu.memory_space<vmem>>, vector<1x4xf32>
    %39 = vector.shape_cast %38 : vector<1x4xf32> to vector<4xf32>
    %40 = vector.shape_cast %39 : vector<4xf32> to vector<1x4xf32>
    %41 = vector.broadcast %40 : vector<1x4xf32> to vector<256x4xf32>
    %42 = arith.addf %37, %41 : vector<256x4xf32>
    %cst_57 = arith.constant 0.000000e+00 : f32
    %43 = vector.broadcast %cst_57 : f32 to vector<256x4xf32>
    %44 = arith.maximumf %42, %43 : vector<256x4xf32>
    %45 = vector.shape_cast %44 : vector<256x4xf32> to vector<16x16x4xf32>
    %c0_58 = arith.constant 0 : index
    %c0_59 = arith.constant 0 : index
    %c0_60 = arith.constant 0 : index
    %c0_61 = arith.constant 0 : index
    %46 = vector.load %arg5[%c0_58, %c0_59, %c0_60, %c0_61] : memref<1x16x16x4xf32, #tpu.memory_space<vmem>>, vector<1x16x16x4xf32>
    %47 = vector.shape_cast %46 : vector<1x16x16x4xf32> to vector<16x16x4xf32>
    %48 = vector.shape_cast %45 : vector<16x16x4xf32> to vector<1x16x16x4xf32>
    tpu.vector_store %arg5[%c0_58, %c0_59, %c0_60, %c0_61], %48 {strides = array<i32>} : memref<1x16x16x4xf32, #tpu.memory_space<vmem>>, vector<1x16x16x4xf32>,
    return
  }
  func.func @transform_0(%arg0: i32) -> (i32, i32, i32, i32) {
    %c0_i32 = arith.constant 0 : i32
    %c0_i32_0 = arith.constant 0 : i32
    %c0_i32_1 = arith.constant 0 : i32
    %c0_i32_2 = arith.constant 0 : i32
    return %arg0, %c0_i32, %c0_i32_0, %c0_i32_1 : i32, i32, i32, i32
  }
  func.func @transform_1(%arg0: i32) -> (i32, i32, i32, i32) {
    %c0_i32 = arith.constant 0 : i32
    %c0_i32_0 = arith.constant 0 : i32
    %c0_i32_1 = arith.constant 0 : i32
    %c0_i32_2 = arith.constant 0 : i32
    return %arg0, %c0_i32, %c0_i32_0, %c0_i32_1 : i32, i32, i32, i32
  }
  func.func @transform_2(%arg0: i32) -> (i32, i32) {
    %c0_i32 = arith.constant 0 : i32
    %c0_i32_0 = arith.constant 0 : i32
    %c0_i32_1 = arith.constant 0 : i32
    return %c0_i32, %c0_i32_0 : i32, i32
  }
  func.func @transform_3(%arg0: i32) -> (i32, i32) {
    %c0_i32 = arith.constant 0 : i32
    %c0_i32_0 = arith.constant 0 : i32
    %c0_i32_1 = arith.constant 0 : i32
    return %c0_i32, %c0_i32_0 : i32, i32
  }
  func.func @transform_4(%arg0: i32) -> (i32, i32, i32, i32) {
    %c0_i32 = arith.constant 0 : i32
    %c0_i32_0 = arith.constant 0 : i32
    %c0_i32_1 = arith.constant 0 : i32
    %c0_i32_2 = arith.constant 0 : i32
    return %arg0, %c0_i32, %c0_i32_0, %c0_i32_1 : i32, i32, i32, i32
  }
}

</mosaic_0001>

<bundles_post_ra>
// kernel: up_forward.1
= control target key start
LH: loop header
LB: loop body
LE: loop exit
PB: predicated region body
PF: predicated region fallthrough
CT: control target
= control target key end

     0   :  { %s2886_s15 = smov 0   ;;  %s4099_s0 = inlined_call_operand.vmem [shape: f32[2,16,16,4], index: 0, kind: input, shape index: {}]   ;;  %s4100_s1 = inlined_call_operand.vmem [shape: f32[2,16,16,4], index: 1, kind: input, shape index: {}]   ;;  %s4101_s2 = inlined_call_operand.vmem [shape: f32[72,4], index: 2, kind: input, shape index: {}]   ;;  %s4102_s3 = inlined_call_operand.vmem [shape: f32[1,4], index: 3, kind: input, shape index: {}]   ;;  %s4103_s4 = inlined_call_operand.vmem [shape: f32[2,16,16,4], index: 4, kind: output, shape index: {}]  }
   0x1 LB: > { %s2643_s16 = sadd.s32 4294967295, %s2849_s15   ;;  %p2647_p0 = scmp.ge.s32.totalorder %s2849_s15, 1  ;;  %s2849_s15 = sphi %s2886_s15, %s14_s15  }
   0x2   : > { %p172_p1 = scmp.lt.s32.totalorder %s2849_s15, 3 }
   0x4   : > { %p173_p2 = pnand %p2647_p0, %p172_p1 }
   0x5   : > { %p2896_p3 = scmp.lt.s32.totalorder (!%p173_p2), %s2643_s16, 1  ;;  %vm218_vm0 = vcmask (!%p173_p2), 64512   ;;  %v2851_v0 = vmov (!%p173_p2), 0.0   ;;  %vm221_vm1 = vcmask (!%p173_p2), 58368   ;;  %s2852_s22 = smov (!%p173_p2), 4   ;;  %vm307_vm2 = vcmask (!%p173_p2), 31744  }
   0x6   : > { %176 = sbr.rel (%p173_p2) target bundleno = 985 (0x3d9), region = 36  ;;  %226 = vst.msk [vmem:[#allocation2 + $0x30] sm:$0xff] (!%p173_p2), %vm218_vm0, %v2851_v0  ;;  %227 = vst.msk [vmem:[#allocation2 + $0x38] sm:$0xff] (!%p173_p2), %vm218_vm0, %v2851_v0  ;;  %s2853_s26 = smov (!%p173_p2), 8   ;;  %vm500_vm3 = vcmask (!%p173_p2), 64544   ;;  %vm757_vm4 = vcmask (!%p173_p2), 130112  }
   0x7   : > { %219 = vst.msk [vmem:[#allocation2] sm:$0xff] (!%p173_p2), %vm218_vm0, %v2851_v0  ;;  %220 = vst.msk [vmem:[#allocation2 + $0x8] sm:$0xff] (!%p173_p2), %vm218_vm0, %v2851_v0  ;;  %s2854_s27 = smov (!%p173_p2), 16   ;;  %vm950_vm5 = vcmask (!%p173_p2), 195712   ;;  %s2855_s28 = smov (!%p173_p2), 24   ;;  %vm1143_vm6 = vcmask (!%p173_p2), 261312  }
   0x8   : > { %223 = vst.msk [vmem:[#allocation2 + $0x18] sm:$0xff] (!%p173_p2), %vm218_vm0, %v2851_v0  ;;  %224 = vst.msk [vmem:[#allocation2 + $0x20] sm:$0xff] (!%p173_p2), %vm218_vm0, %v2851_v0  ;;  %s2856_s29 = smov (!%p173_p2), 32   ;;  %s2857_s30 = smov (!%p173_p2), 40   ;;  %vm1336_vm7 = vcmask (!%p173_p2), 326912   ;;  %vm1529_vm8 = vcmask (!%p173_p2), 392512  }
   0x9   : > { %229 = vst.msk [vmem:[#allocation2 + $0x48] sm:$0xff] (!%p173_p2), %vm218_vm0, %v2851_v0  ;;  %230 = vst.msk [vmem:[#allocation2 + $0x50] sm:$0xff] (!%p173_p2), %vm218_vm0, %v2851_v0  ;;  %s2858_s5 = smov (!%p173_p2), 48   ;;  %s2859_s6 = smov (!%p173_p2), 56   ;;  %vm1723_vm9 = vcmask (!%p173_p2), 458112   ;;  %vm1916_vm10 = vcmask (!%p173_p2), 523712  }
   0xa   : > { %232 = vst.msk [vmem:[#allocation2 + $0x60] sm:$0xff] (!%p173_p2), %vm218_vm0, %v2851_v0  ;;  %233 = vst.msk [vmem:[#allocation2 + $0x68] sm:$0xff] (!%p173_p2), %vm218_vm0, %v2851_v0  ;;  %vm2109_vm11 = vcmask (!%p173_p2), 589312   ;;  %vm2190_vm12 = vcmask (!%p173_p2), 588800  }
   0xb   : > { %235 = vst.msk [vmem:[#allocation2 + $0x78] sm:$0xff] (!%p173_p2), %vm218_vm0, %v2851_v0  ;;  %236 = vst.msk [vmem:[#allocation2 + $0x80] sm:$0xff] (!%p173_p2), %vm218_vm0, %v2851_v0 }
   0xc   : > { %238 = vst.msk [vmem:[#allocation2 + $0x90] sm:$0xff] (!%p173_p2), %vm218_vm0, %v2851_v0  ;;  %239 = vst.msk [vmem:[#allocation2 + $0x98] sm:$0xff] (!%p173_p2), %vm218_vm0, %v2851_v0 }
   0xd   : > { %241 = vst.msk [vmem:[#allocation2 + $0xa8] sm:$0xff] %vm218_vm0, %v2851_v0  ;;  %242 = vst.msk [vmem:[#allocation2 + $0xb0] sm:$0xff] %vm218_vm0, %v2851_v0  ;;  %s4106_s16 = smov (!%p2896_p3, %s2643_s16), 1 }
   0xe   : > { %244 = vst.msk [vmem:[#allocation2 + $0xc0] sm:$0xff] %vm218_vm0, %v2851_v0  ;;  %245 = vst.msk [vmem:[#allocation2 + $0xc8] sm:$0xff] %vm218_vm0, %v2851_v0  ;;  %s2958_s18 = sshll.u32 %s4106_s16, 8  ;;  %v597_v63 = vld [vmem:[#allocation2 + $0x1] sm:$0xff] }
   0xf   : > { %247 = vst.msk [vmem:[#allocation2 + $0xd8] sm:$0xff] %vm218_vm0, %v2851_v0  ;;  %248 = vst.msk [vmem:[#allocation2 + $0xe0] sm:$0xff] %vm218_vm0, %v2851_v0  ;;  %s2964_s21 = scalar_lea.vmem %s4100_s1, %s2958_s18  ;;  %s2980_s25 = scalar_lea.vmem %s4099_s0, %s2958_s18 }
  0x10   : > { %250 = vst.msk [vmem:[#allocation2 + $0xf0] sm:$0xff] %vm218_vm0, %v2851_v0  ;;  %251 = vst.msk [vmem:[#allocation2 + $0xf8] sm:$0xff] %vm218_vm0, %v2851_v0  ;;  %v342_v1 = vld [vmem:[%s2964_s21 + $0x10] sm:$0xff]  ;;  %v340_v2 = vld [vmem:[%s2964_s21] sm:$0xff] }
  0x11   : > { %253 = vst.msk [vmem:[#allocation2 + $0x108] sm:$0xff] %vm218_vm0, %v2851_v0  ;;  %254 = vst.msk [vmem:[#allocation2 + $0x110] sm:$0xff] %vm218_vm0, %v2851_v0  ;;  %408 = vrot.lane.b32.xlu1 %v342_v1, %s2852_s22  ;;  %404 = vrot.lane.b32.xlu0 %v340_v2, %s2852_s22  ;;  %v343_v3 = vld [vmem:[%s2964_s21 + $0x18] sm:$0xff]  ;;  %v341_v4 = vld [vmem:[%s2964_s21 + $0x8] sm:$0xff] }
  0x12   : > { %256 = vst.msk [vmem:[#allocation2 + $0x120] sm:$0xff] %vm218_vm0, %v2851_v0  ;;  %257 = vst.msk [vmem:[#allocation2 + $0x128] sm:$0xff] %vm218_vm0, %v2851_v0  ;;  %v344_v5 = vld [vmem:[%s2964_s21 + $0x20] sm:$0xff]  ;;  %v345_v6 = vld [vmem:[%s2964_s21 + $0x28] sm:$0xff] }
  0x13   : > { %259 = vst.msk [vmem:[#allocation2 + $0x138] sm:$0xff] %vm218_vm0, %v2851_v0  ;;  %260 = vst.msk [vmem:[#allocation2 + $0x140] sm:$0xff] %vm218_vm0, %v2851_v0  ;;  %v346_v7 = vld [vmem:[%s2964_s21 + $0x30] sm:$0xff]  ;;  %v347_v8 = vld [vmem:[%s2964_s21 + $0x38] sm:$0xff] }
  0x14   : > { %262 = vst.msk [vmem:[#allocation2 + $0x150] sm:$0xff] %vm218_vm0, %v2851_v0  ;;  %263 = vst.msk [vmem:[#allocation2 + $0x158] sm:$0xff] %vm218_vm0, %v2851_v0  ;;  %v276_v9 = vld [vmem:[%s2980_s25 + $0x10] sm:$0xff]  ;;  %v274_v10 = vld [vmem:[%s2980_s25] sm:$0xff] }
  0x15   : > { %265 = vst.msk [vmem:[#allocation2 + $0x168] sm:$0xff] %vm218_vm0, %v2851_v0  ;;  %266 = vst.msk [vmem:[#allocation2 + $0x170] sm:$0xff] %vm218_vm0, %v2851_v0  ;;  %410 = vrot.lane.b32.xlu1 %v343_v3, %s2852_s22  ;;  %406 = vrot.lane.b32.xlu0 %v341_v4, %s2852_s22  ;;  %v348_v11 = vld [vmem:[%s2964_s21 + $0x40] sm:$0xff]  ;;  %v277_v12 = vld [vmem:[%s2980_s25 + $0x18] sm:$0xff] }
  0x16   : > { %268 = vst.msk [vmem:[#allocation2 + $0x180] sm:$0xff] %vm218_vm0, %v2851_v0  ;;  %269 = vst.msk [vmem:[#allocation2 + $0x188] sm:$0xff] %vm218_vm0, %v2851_v0  ;;  %v275_v13 = vld [vmem:[%s2980_s25 + $0x8] sm:$0xff]  ;;  %v278_v15 = vld [vmem:[%s2980_s25 + $0x20] sm:$0xff] }
  0x17   : > { %271 = vst.msk [vmem:[#allocation2 + $0x198] sm:$0xff] %vm218_vm0, %v2851_v0  ;;  %272 = vst.msk [vmem:[#allocation2 + $0x1a0] sm:$0xff] %vm218_vm0, %v2851_v0  ;;  %v349_v14 = vld [vmem:[%s2964_s21 + $0x48] sm:$0xff]  ;;  %v280_v17 = vld [vmem:[%s2980_s25 + $0x30] sm:$0xff] }
  0x18   : > { %228 = vst.msk [vmem:[#allocation2 + $0x40] sm:$0x3] %vm221_vm1, %v2851_v0  ;;  %222 = vst.msk [vmem:[#allocation2 + $0x10] sm:$0x3] %vm221_vm1, %v2851_v0  ;;  %v279_v16 = vld [vmem:[%s2980_s25 + $0x28] sm:$0xff]  ;;  %v281_v18 = vld [vmem:[%s2980_s25 + $0x38] sm:$0xff] }
  0x19   : > { %225 = vst.msk [vmem:[#allocation2 + $0x28] sm:$0x3] %vm221_vm1, %v2851_v0  ;;  %231 = vst.msk [vmem:[#allocation2 + $0x58] sm:$0x3] %vm221_vm1, %v2851_v0  ;;  %412 = vrot.lane.b32.xlu0 %v344_v5, %s2852_s22  ;;  %414 = vrot.lane.b32.xlu1 %v345_v6, %s2852_s22  ;;  %v282_v19 = vld [vmem:[%s2980_s25 + $0x40] sm:$0xff]  ;;  %v283_v20 = vld [vmem:[%s2980_s25 + $0x48] sm:$0xff] }
  0x1a   : > { %234 = vst.msk [vmem:[#allocation2 + $0x70] sm:$0x3] %vm221_vm1, %v2851_v0  ;;  %237 = vst.msk [vmem:[#allocation2 + $0x88] sm:$0x3] %vm221_vm1, %v2851_v0  ;;  %v284_v21 = vld [vmem:[%s2980_s25 + $0x50] sm:$0xff]  ;;  %v285_v22 = vld [vmem:[%s2980_s25 + $0x58] sm:$0xff] }
  0x1b   : > { %240 = vst.msk [vmem:[#allocation2 + $0xa0] sm:$0x3] %vm221_vm1, %v2851_v0  ;;  %243 = vst.msk [vmem:[#allocation2 + $0xb8] sm:$0x3] %vm221_vm1, %v2851_v0  ;;  %v286_v23 = vld [vmem:[%s2980_s25 + $0x60] sm:$0xff]  ;;  %v287_v24 = vld [vmem:[%s2980_s25 + $0x68] sm:$0xff] }
  0x1c   : > { %246 = vst.msk [vmem:[#allocation2 + $0xd0] sm:$0x3] %vm221_vm1, %v2851_v0  ;;  %249 = vst.msk [vmem:[#allocation2 + $0xe8] sm:$0x3] %vm221_vm1, %v2851_v0  ;;  %v288_v25 = vld [vmem:[%s2980_s25 + $0x70] sm:$0xff]  ;;  %v289_v26 = vld [vmem:[%s2980_s25 + $0x78] sm:$0xff] }
  0x1d   : > { %252 = vst.msk [vmem:[#allocation2 + $0x100] sm:$0x3] %vm221_vm1, %v2851_v0  ;;  %255 = vst.msk [vmem:[#allocation2 + $0x118] sm:$0x3] %vm221_vm1, %v2851_v0  ;;  %416 = vrot.lane.b32.xlu0 %v346_v7, %s2852_s22  ;;  %418 = vrot.lane.b32.xlu1 %v347_v8, %s2852_s22  ;;  %v350_v27 = vld [vmem:[%s2964_s21 + $0x50] sm:$0xff]  ;;  %v351_v28 = vld [vmem:[%s2964_s21 + $0x58] sm:$0xff] }
  0x1e   : > { %258 = vst.msk [vmem:[#allocation2 + $0x130] sm:$0x3] %vm221_vm1, %v2851_v0  ;;  %261 = vst.msk [vmem:[#allocation2 + $0x148] sm:$0x3] %vm221_vm1, %v2851_v0  ;;  %v290_v29 = vld [vmem:[%s2980_s25 + $0x80] sm:$0xff]  ;;  %v291_v30 = vld [vmem:[%s2980_s25 + $0x88] sm:$0xff] }
  0x1f   : > { %264 = vst.msk [vmem:[#allocation2 + $0x160] sm:$0x3] %vm221_vm1, %v2851_v0  ;;  %267 = vst.msk [vmem:[#allocation2 + $0x178] sm:$0x3] %vm221_vm1, %v2851_v0  ;;  %v352_v31 = vld [vmem:[%s2964_s21 + $0x60] sm:$0xff]  ;;  %v353_v32 = vld [vmem:[%s2964_s21 + $0x68] sm:$0xff] }
  0x20   : > { %270 = vst.msk [vmem:[#allocation2 + $0x190] sm:$0x3] %vm221_vm1, %v2851_v0  ;;  %273 = vst.msk [vmem:[#allocation2 + $0x1a8] sm:$0x3] %vm221_vm1, %v2851_v0  ;;  %v292_v33 = vld [vmem:[%s2980_s25 + $0x90] sm:$0xff]  ;;  %v293_v34 = vld [vmem:[%s2980_s25 + $0x98] sm:$0xff] }
  0x21   : > { %310 = vst.msk [vmem:[#allocation2 + $0x31] sm:$0xff] %vm307_vm2, %v276_v9  ;;  %308 = vst.msk [vmem:[#allocation2 + $0x19] sm:$0xff] %vm307_vm2, %v274_v10  ;;  %420 = vrot.lane.b32.xlu0 %v348_v11, %s2852_s22  ;;  %422 = vrot.lane.b32.xlu1 %v349_v14, %s2852_s22  ;;  %v354_v35 = vld [vmem:[%s2964_s21 + $0x70] sm:$0xff]  ;;  %v355_v36 = vld [vmem:[%s2964_s21 + $0x78] sm:$0xff] }
  0x22   : > { %311 = vst.msk [vmem:[#allocation2 + $0x39] sm:$0xff] %vm307_vm2, %v277_v12  ;;  %309 = vst.msk [vmem:[#allocation2 + $0x21] sm:$0xff] %vm307_vm2, %v275_v13  ;;  %v294_v37 = vld [vmem:[%s2980_s25 + $0xa0] sm:$0xff]  ;;  %v295_v38 = vld [vmem:[%s2980_s25 + $0xa8] sm:$0xff] }
  0x23   : > { %312 = vst.msk [vmem:[#allocation2 + $0x49] sm:$0xff] %vm307_vm2, %v278_v15  ;;  %313 = vst.msk [vmem:[#allocation2 + $0x51] sm:$0xff] %vm307_vm2, %v279_v16  ;;  %v356_v39 = vld [vmem:[%s2964_s21 + $0x80] sm:$0xff]  ;;  %v357_v40 = vld [vmem:[%s2964_s21 + $0x88] sm:$0xff] }
  0x24   : > { %314 = vst.msk [vmem:[#allocation2 + $0x61] sm:$0xff] %vm307_vm2, %v280_v17  ;;  %315 = vst.msk [vmem:[#allocation2 + $0x69] sm:$0xff] %vm307_vm2, %v281_v18  ;;  %v296_v41 = vld [vmem:[%s2980_s25 + $0xb0] sm:$0xff]  ;;  %v297_v42 = vld [vmem:[%s2980_s25 + $0xb8] sm:$0xff] }
  0x25   : > { %316 = vst.msk [vmem:[#allocation2 + $0x79] sm:$0xff] %vm307_vm2, %v282_v19  ;;  %317 = vst.msk [vmem:[#allocation2 + $0x81] sm:$0xff] %vm307_vm2, %v283_v20  ;;  %424 = vrot.lane.b32.xlu0 %v350_v27, %s2852_s22  ;;  %426 = vrot.lane.b32.xlu1 %v351_v28, %s2852_s22  ;;  %v358_v43 = vld [vmem:[%s2964_s21 + $0x90] sm:$0xff]  ;;  %v359_v44 = vld [vmem:[%s2964_s21 + $0x98] sm:$0xff] }
  0x26   : > { %318 = vst.msk [vmem:[#allocation2 + $0x91] sm:$0xff] %vm307_vm2, %v284_v21  ;;  %319 = vst.msk [vmem:[#allocation2 + $0x99] sm:$0xff] %vm307_vm2, %v285_v22  ;;  %v298_v45 = vld [vmem:[%s2980_s25 + $0xc0] sm:$0xff]  ;;  %v299_v46 = vld [vmem:[%s2980_s25 + $0xc8] sm:$0xff] }
  0x27   : > { %320 = vst.msk [vmem:[#allocation2 + $0xa9] sm:$0xff] %vm307_vm2, %v286_v23  ;;  %321 = vst.msk [vmem:[#allocation2 + $0xb1] sm:$0xff] %vm307_vm2, %v287_v24  ;;  %v360_v47 = vld [vmem:[%s2964_s21 + $0xa0] sm:$0xff]  ;;  %v361_v48 = vld [vmem:[%s2964_s21 + $0xa8] sm:$0xff] }
  0x28   : > { %322 = vst.msk [vmem:[#allocation2 + $0xc1] sm:$0xff] %vm307_vm2, %v288_v25  ;;  %323 = vst.msk [vmem:[#allocation2 + $0xc9] sm:$0xff] %vm307_vm2, %v289_v26  ;;  %v300_v49 = vld [vmem:[%s2980_s25 + $0xd0] sm:$0xff]  ;;  %v301_v50 = vld [vmem:[%s2980_s25 + $0xd8] sm:$0xff] }
  0x29   : > { %324 = vst.msk [vmem:[#allocation2 + $0xd9] sm:$0xff] %vm307_vm2, %v290_v29  ;;  %325 = vst.msk [vmem:[#allocation2 + $0xe1] sm:$0xff] %vm307_vm2, %v291_v30  ;;  %428 = vrot.lane.b32.xlu0 %v352_v31, %s2852_s22  ;;  %430 = vrot.lane.b32.xlu1 %v353_v32, %s2852_s22  ;;  %v362_v51 = vld [vmem:[%s2964_s21 + $0xb0] sm:$0xff]  ;;  %v363_v52 = vld [vmem:[%s2964_s21 + $0xb8] sm:$0xff] }
  0x2a   : > { %326 = vst.msk [vmem:[#allocation2 + $0xf1] sm:$0xff] %vm307_vm2, %v292_v33  ;;  %327 = vst.msk [vmem:[#allocation2 + $0xf9] sm:$0xff] %vm307_vm2, %v293_v34  ;;  %v302_v53 = vld [vmem:[%s2980_s25 + $0xe0] sm:$0xff]  ;;  %v303_v54 = vld [vmem:[%s2980_s25 + $0xe8] sm:$0xff] }
  0x2b   : > { %328 = vst.msk [vmem:[#allocation2 + $0x109] sm:$0xff] %vm307_vm2, %v294_v37  ;;  %329 = vst.msk [vmem:[#allocation2 + $0x111] sm:$0xff] %vm307_vm2, %v295_v38  ;;  %v364_v55 = vld [vmem:[%s2964_s21 + $0xc0] sm:$0xff]  ;;  %v365_v56 = vld [vmem:[%s2964_s21 + $0xc8] sm:$0xff] }
  0x2c   : > { %330 = vst.msk [vmem:[#allocation2 + $0x121] sm:$0xff] %vm307_vm2, %v296_v41  ;;  %331 = vst.msk [vmem:[#allocation2 + $0x129] sm:$0xff] %vm307_vm2, %v297_v42  ;;  %v366_v57 = vld [vmem:[%s2964_s21 + $0xd0] sm:$0xff]  ;;  %v367_v58 = vld [vmem:[%s2964_s21 + $0xd8] sm:$0xff] }
  0x2d   : > { %432 = vrot.lane.b32.xlu0 %v354_v35, %s2852_s22  ;;  %434 = vrot.lane.b32.xlu1 %v355_v36, %s2852_s22  ;;  %332 = vst.msk [vmem:[#allocation2 + $0x139] sm:$0xff] %vm307_vm2, %v298_v45  ;;  %333 = vst.msk [vmem:[#allocation2 + $0x141] sm:$0xff] %vm307_vm2, %v299_v46  ;;  %v368_v59 = vld [vmem:[%s2964_s21 + $0xe0] sm:$0xff]  ;;  %v369_v60 = vld [vmem:[%s2964_s21 + $0xe8] sm:$0xff] }
  0x2e   : > { %334 = vst.msk [vmem:[#allocation2 + $0x151] sm:$0xff] %vm307_vm2, %v300_v49  ;;  %335 = vst.msk [vmem:[#allocation2 + $0x159] sm:$0xff] %vm307_vm2, %v301_v50  ;;  %v370_v61 = vld [vmem:[%s2964_s21 + $0xf0] sm:$0xff]  ;;  %v371_v62 = vld [vmem:[%s2964_s21 + $0xf8] sm:$0xff]  ;;  %s2860_s21 = smov 64  }
  0x2f   : > { %336 = vst.msk [vmem:[#allocation2 + $0x169] sm:$0xff] %vm307_vm2, %v302_v53  ;;  %337 = vst.msk [vmem:[#allocation2 + $0x171] sm:$0xff] %vm307_vm2, %v303_v54  ;;  %v598_v0 = vld [vmem:[#allocation2 + $0x9] sm:$0xff]  ;;  %v305_v4 = vld [vmem:[%s2980_s25 + $0xf8] sm:$0xff] }
  0x30   : > { %v790_v1 = vld [vmem:[#allocation2 + $0x2] sm:$0xff]  ;;  %v791_v2 = vld [vmem:[#allocation2 + $0xa] sm:$0xff]  ;;  %339 = vst.msk [vmem:[#allocation2 + $0x189] sm:$0xff] %vm307_vm2, %v305_v4 }
  0x31   : > { %436 = vrot.lane.b32.xlu0 %v356_v39, %s2852_s22  ;;  %438 = vrot.lane.b32.xlu1 %v357_v40, %s2852_s22  ;;  %v304_v3 = vld [vmem:[%s2980_s25 + $0xf0] sm:$0xff]  ;;  %v533_v5 = vld [vmem:[#allocation2] sm:$0xff]  ;;  %v534_v6 = vld [vmem:[#allocation2 + $0x8] sm:$0xff] }
  0x32   : > { %338 = vst.msk [vmem:[#allocation2 + $0x181] sm:$0xff] %vm307_vm2, %v304_v3 }
  0x33   : > { %565 = vst.msk [vmem:[#allocation3] sm:$0xff] %vm218_vm0, %v533_v5  ;;  %566 = vst.msk [vmem:[#allocation3 + $0x8] sm:$0xff] %vm218_vm0, %v534_v6 }
  0x35   : > { %440 = vrot.lane.b32.xlu0 %v358_v43, %s2852_s22  ;;  %442 = vrot.lane.b32.xlu1 %v359_v44, %s2852_s22 }
  0x39   : > { %444 = vrot.lane.b32.xlu0 %v360_v47, %s2852_s22  ;;  %446 = vrot.lane.b32.xlu1 %v361_v48, %s2852_s22 }
  0x3d   : > { %448 = vrot.lane.b32.xlu0 %v362_v51, %s2852_s22  ;;  %450 = vrot.lane.b32.xlu1 %v363_v52, %s2852_s22 }
  0x41   : > { %452 = vrot.lane.b32.xlu0 %v364_v55, %s2852_s22  ;;  %454 = vrot.lane.b32.xlu1 %v365_v56, %s2852_s22 }
  0x45   : > { %456 = vrot.lane.b32.xlu0 %v366_v57, %s2852_s22  ;;  %458 = vrot.lane.b32.xlu1 %v367_v58, %s2852_s22 }
  0x49   : > { %460 = vrot.lane.b32.xlu0 %v368_v59, %s2852_s22  ;;  %462 = vrot.lane.b32.xlu1 %v369_v60, %s2852_s22 }
  0x4d   : > { %464 = vrot.lane.b32.xlu0 %v370_v61, %s2852_s22  ;;  %466 = vrot.lane.b32.xlu1 %v371_v62, %s2852_s22 }
  0x51   : > { %661 = vrot.lane.b32.xlu0 %v597_v63, %s2853_s26  ;;  %663 = vrot.lane.b32.xlu1 %v598_v0, %s2853_s26 }
  0x55   : > { %854 = vrot.lane.b32.xlu0 %v790_v1, %s2854_s27  ;;  %856 = vrot.lane.b32.xlu1 %v791_v2, %s2854_s27 }
  0x83   : > { %v409_v7 = vpop.permute.xlu1 %408  ;;  %v405_v8 = vpop.permute.xlu0 %404 }
  0x84   : > { %503 = vst.msk [vmem:[#allocation2 + $0x31] sm:$0xff] %vm500_vm3, %v409_v7  ;;  %501 = vst.msk [vmem:[#allocation2 + $0x19] sm:$0xff] %vm500_vm3, %v405_v8 }
  0x87   : > { %v411_v9 = vpop.permute.xlu1 %410  ;;  %v407_v10 = vpop.permute.xlu0 %406 }
  0x88   : > { %504 = vst.msk [vmem:[#allocation2 + $0x39] sm:$0xff] %vm500_vm3, %v411_v9  ;;  %502 = vst.msk [vmem:[#allocation2 + $0x21] sm:$0xff] %vm500_vm3, %v407_v10 }
  0x8b   : > { %v413_v11 = vpop.permute.xlu0 %412  ;;  %v3110_v12 = vld [vmem:[#allocation2 + $0x19] sm:$0xff]  ;;  %v415_v13 = vpop.permute.xlu1 %414  ;;  %v3120_v15 = vld [vmem:[#allocation2 + $0x30] sm:$0xff] }
  0x8c   : > { %v3112_v14 = vld [vmem:[#allocation2 + $0x18] sm:$0xff]  ;;  %505 = vst.msk [vmem:[#allocation2 + $0x49] sm:$0xff] %vm500_vm3, %v413_v11  ;;  %665 = vrot.lane.b32.xlu0 %v3110_v12, %s2853_s26  ;;  %506 = vst.msk [vmem:[#allocation2 + $0x51] sm:$0xff] %vm500_vm3, %v415_v13 }
  0x8d   : > { %567 = vst.msk [vmem:[#allocation3 + $0x10] sm:$0xff] %vm218_vm0, %v3112_v14  ;;  %v3122_v16 = vld [vmem:[#allocation2 + $0x31] sm:$0xff]  ;;  %569 = vst.msk [vmem:[#allocation3 + $0x20] sm:$0xff] %vm218_vm0, %v3120_v15 }
  0x8f   : > { %v417_v17 = vpop.permute.xlu0 %416  ;;  %v3126_v18 = vld [vmem:[#allocation2 + $0x21] sm:$0xff]  ;;  %v419_v19 = vpop.permute.xlu1 %418  ;;  %v3134_v20 = vld [vmem:[#allocation2 + $0x39] sm:$0xff] }
  0x90   : > { %507 = vst.msk [vmem:[#allocation2 + $0x61] sm:$0xff] %vm500_vm3, %v417_v17  ;;  %667 = vrot.lane.b32.xlu1 %v3126_v18, %s2853_s26  ;;  %669 = vrot.lane.b32.xlu0 %v3122_v16, %s2853_s26  ;;  %508 = vst.msk [vmem:[#allocation2 + $0x69] sm:$0xff] %vm500_vm3, %v419_v19  ;;  %v3136_v21 = vld [vmem:[#allocation2 + $0x20] sm:$0xff]  ;;  %v3138_v22 = vld [vmem:[#allocation2 + $0x38] sm:$0xff] }
  0x91   : > { %568 = vst.msk [vmem:[#allocation3 + $0x18] sm:$0xff] %vm218_vm0, %v3136_v21  ;;  %570 = vst.msk [vmem:[#allocation3 + $0x28] sm:$0xff] %vm218_vm0, %v3138_v22 }
  0x93   : > { %v421_v23 = vpop.permute.xlu0 %420  ;;  %v603_v24 = vld [vmem:[#allocation2 + $0x49] sm:$0xff]  ;;  %v423_v25 = vpop.permute.xlu1 %422  ;;  %v604_v28 = vld [vmem:[#allocation2 + $0x51] sm:$0xff] }
  0x94   : > { %509 = vst.msk [vmem:[#allocation2 + $0x79] sm:$0xff] %vm500_vm3, %v421_v23  ;;  %671 = vrot.lane.b32.xlu1 %v3134_v20, %s2853_s26  ;;  %673 = vrot.lane.b32.xlu0 %v603_v24, %s2853_s26  ;;  %510 = vst.msk [vmem:[#allocation2 + $0x81] sm:$0xff] %vm500_vm3, %v423_v25  ;;  %v3149_v26 = vld [vmem:[#allocation2 + $0x48] sm:$0xff]  ;;  %v3151_v27 = vld [vmem:[#allocation2 + $0x50] sm:$0xff] }
  0x95   : > { %571 = vst.msk [vmem:[#allocation3 + $0x30] sm:$0xff] %vm218_vm0, %v3149_v26  ;;  %572 = vst.msk [vmem:[#allocation3 + $0x38] sm:$0xff] %vm218_vm0, %v3151_v27 }
  0x97   : > { %v425_v29 = vpop.permute.xlu0 %424  ;;  %v605_v30 = vld [vmem:[#allocation2 + $0x61] sm:$0xff]  ;;  %v427_v31 = vpop.permute.xlu1 %426  ;;  %v606_v34 = vld [vmem:[#allocation2 + $0x69] sm:$0xff] }
  0x98   : > { %511 = vst.msk [vmem:[#allocation2 + $0x91] sm:$0xff] %vm500_vm3, %v425_v29  ;;  %675 = vrot.lane.b32.xlu1 %v604_v28, %s2853_s26  ;;  %677 = vrot.lane.b32.xlu0 %v605_v30, %s2853_s26  ;;  %512 = vst.msk [vmem:[#allocation2 + $0x99] sm:$0xff] %vm500_vm3, %v427_v31  ;;  %v3161_v32 = vld [vmem:[#allocation2 + $0x60] sm:$0xff]  ;;  %v3163_v33 = vld [vmem:[#allocation2 + $0x68] sm:$0xff] }
  0x99   : > { %573 = vst.msk [vmem:[#allocation3 + $0x40] sm:$0xff] %vm218_vm0, %v3161_v32  ;;  %574 = vst.msk [vmem:[#allocation3 + $0x48] sm:$0xff] %vm218_vm0, %v3163_v33 }
  0x9b   : > { %v429_v35 = vpop.permute.xlu0 %428  ;;  %v607_v36 = vld [vmem:[#allocation2 + $0x79] sm:$0xff]  ;;  %v431_v37 = vpop.permute.xlu1 %430  ;;  %v608_v40 = vld [vmem:[#allocation2 + $0x81] sm:$0xff] }
  0x9c   : > { %513 = vst.msk [vmem:[#allocation2 + $0xa9] sm:$0xff] %vm500_vm3, %v429_v35  ;;  %679 = vrot.lane.b32.xlu1 %v606_v34, %s2853_s26  ;;  %681 = vrot.lane.b32.xlu0 %v607_v36, %s2853_s26  ;;  %514 = vst.msk [vmem:[#allocation2 + $0xb1] sm:$0xff] %vm500_vm3, %v431_v37  ;;  %v3173_v38 = vld [vmem:[#allocation2 + $0x78] sm:$0xff]  ;;  %v3175_v39 = vld [vmem:[#allocation2 + $0x80] sm:$0xff] }
  0x9d   : > { %575 = vst.msk [vmem:[#allocation3 + $0x50] sm:$0xff] %vm218_vm0, %v3173_v38  ;;  %576 = vst.msk [vmem:[#allocation3 + $0x58] sm:$0xff] %vm218_vm0, %v3175_v39 }
  0x9f   : > { %v433_v41 = vpop.permute.xlu0 %432  ;;  %v609_v42 = vld [vmem:[#allocation2 + $0x91] sm:$0xff]  ;;  %v435_v43 = vpop.permute.xlu1 %434  ;;  %v610_v46 = vld [vmem:[#allocation2 + $0x99] sm:$0xff] }
  0xa0   : > { %515 = vst.msk [vmem:[#allocation2 + $0xc1] sm:$0xff] %vm500_vm3, %v433_v41  ;;  %683 = vrot.lane.b32.xlu1 %v608_v40, %s2853_s26  ;;  %685 = vrot.lane.b32.xlu0 %v609_v42, %s2853_s26  ;;  %516 = vst.msk [vmem:[#allocation2 + $0xc9] sm:$0xff] %vm500_vm3, %v435_v43  ;;  %v3185_v44 = vld [vmem:[#allocation2 + $0x90] sm:$0xff]  ;;  %v3187_v45 = vld [vmem:[#allocation2 + $0x98] sm:$0xff] }
  0xa1   : > { %577 = vst.msk [vmem:[#allocation3 + $0x60] sm:$0xff] %vm218_vm0, %v3185_v44  ;;  %578 = vst.msk [vmem:[#allocation3 + $0x68] sm:$0xff] %vm218_vm0, %v3187_v45 }
  0xa3   : > { %v437_v47 = vpop.permute.xlu0 %436  ;;  %v611_v48 = vld [vmem:[#allocation2 + $0xa9] sm:$0xff]  ;;  %v439_v49 = vpop.permute.xlu1 %438  ;;  %v612_v52 = vld [vmem:[#allocation2 + $0xb1] sm:$0xff] }
  0xa4   : > { %517 = vst.msk [vmem:[#allocation2 + $0xd9] sm:$0xff] %vm500_vm3, %v437_v47  ;;  %687 = vrot.lane.b32.xlu1 %v610_v46, %s2853_s26  ;;  %689 = vrot.lane.b32.xlu0 %v611_v48, %s2853_s26  ;;  %518 = vst.msk [vmem:[#allocation2 + $0xe1] sm:$0xff] %vm500_vm3, %v439_v49  ;;  %v3197_v50 = vld [vmem:[#allocation2 + $0xa8] sm:$0xff]  ;;  %v3199_v51 = vld [vmem:[#allocation2 + $0xb0] sm:$0xff] }
  0xa5   : > { %579 = vst.msk [vmem:[#allocation3 + $0x70] sm:$0xff] %vm218_vm0, %v3197_v50  ;;  %580 = vst.msk [vmem:[#allocation3 + $0x78] sm:$0xff] %vm218_vm0, %v3199_v51 }
  0xa7   : > { %v441_v53 = vpop.permute.xlu0 %440  ;;  %v613_v54 = vld [vmem:[#allocation2 + $0xc1] sm:$0xff]  ;;  %v443_v55 = vpop.permute.xlu1 %442  ;;  %v614_v58 = vld [vmem:[#allocation2 + $0xc9] sm:$0xff] }
  0xa8   : > { %519 = vst.msk [vmem:[#allocation2 + $0xf1] sm:$0xff] %vm500_vm3, %v441_v53  ;;  %691 = vrot.lane.b32.xlu1 %v612_v52, %s2853_s26  ;;  %693 = vrot.lane.b32.xlu0 %v613_v54, %s2853_s26  ;;  %520 = vst.msk [vmem:[#allocation2 + $0xf9] sm:$0xff] %vm500_vm3, %v443_v55  ;;  %v3209_v56 = vld [vmem:[#allocation2 + $0xc0] sm:$0xff]  ;;  %v3211_v57 = vld [vmem:[#allocation2 + $0xc8] sm:$0xff] }
  0xa9   : > { %581 = vst.msk [vmem:[#allocation3 + $0x80] sm:$0xff] %vm218_vm0, %v3209_v56  ;;  %582 = vst.msk [vmem:[#allocation3 + $0x88] sm:$0xff] %vm218_vm0, %v3211_v57  ;;  %v3319_v55 = vld [vmem:[#allocation2 + $0x1a] sm:$0xff] }
  0xab   : > { %v445_v59 = vpop.permute.xlu0 %444  ;;  %v3217_v60 = vld [vmem:[#allocation2 + $0xd9] sm:$0xff]  ;;  %v447_v61 = vpop.permute.xlu1 %446  ;;  %v3228_v0 = vld [vmem:[#allocation2 + $0xe1] sm:$0xff] }
  0xac   : > { %521 = vst.msk [vmem:[#allocation2 + $0x109] sm:$0xff] %vm500_vm3, %v445_v59  ;;  %695 = vrot.lane.b32.xlu1 %v614_v58, %s2853_s26  ;;  %697 = vrot.lane.b32.xlu0 %v3217_v60, %s2853_s26  ;;  %522 = vst.msk [vmem:[#allocation2 + $0x111] sm:$0xff] %vm500_vm3, %v447_v61  ;;  %v3224_v62 = vld [vmem:[#allocation2 + $0xd8] sm:$0xff]  ;;  %v3226_v63 = vld [vmem:[#allocation2 + $0xe0] sm:$0xff] }
  0xad   : > { %583 = vst.msk [vmem:[#allocation3 + $0x90] sm:$0xff] %vm218_vm0, %v3224_v62  ;;  %584 = vst.msk [vmem:[#allocation3 + $0x98] sm:$0xff] %vm218_vm0, %v3226_v63  ;;  %v3326_v61 = vld [vmem:[#allocation2 + $0x22] sm:$0xff] }
  0xaf   : > { %v449_v1 = vpop.permute.xlu0 %448  ;;  %v3234_v2 = vld [vmem:[#allocation2 + $0xf1] sm:$0xff]  ;;  %v451_v3 = vpop.permute.xlu1 %450  ;;  %v3246_v6 = vld [vmem:[#allocation2 + $0xf9] sm:$0xff] }
  0xb0   : > { %523 = vst.msk [vmem:[#allocation2 + $0x121] sm:$0xff] %vm500_vm3, %v449_v1  ;;  %699 = vrot.lane.b32.xlu1 %v3228_v0, %s2853_s26  ;;  %701 = vrot.lane.b32.xlu0 %v3234_v2, %s2853_s26  ;;  %524 = vst.msk [vmem:[#allocation2 + $0x129] sm:$0xff] %vm500_vm3, %v451_v3  ;;  %v3242_v4 = vld [vmem:[#allocation2 + $0xf0] sm:$0xff]  ;;  %v3244_v5 = vld [vmem:[#allocation2 + $0xf8] sm:$0xff] }
  0xb1   : > { %585 = vst.msk [vmem:[#allocation3 + $0xa0] sm:$0xff] %vm218_vm0, %v3242_v4  ;;  %586 = vst.msk [vmem:[#allocation3 + $0xa8] sm:$0xff] %vm218_vm0, %v3244_v5  ;;  %v3328_v1 = vld [vmem:[#allocation2 + $0x32] sm:$0xff]  ;;  %v3334_v3 = vld [vmem:[#allocation2 + $0x3a] sm:$0xff] }
  0xb3   : > { %v453_v7 = vpop.permute.xlu0 %452  ;;  %v3252_v8 = vld [vmem:[#allocation2 + $0x109] sm:$0xff]  ;;  %v455_v9 = vpop.permute.xlu1 %454  ;;  %v3264_v13 = vld [vmem:[#allocation2 + $0x111] sm:$0xff] }
  0xb4   : > { %525 = vst.msk [vmem:[#allocation2 + $0x139] sm:$0xff] %vm500_vm3, %v453_v7  ;;  %703 = vrot.lane.b32.xlu1 %v3246_v6, %s2853_s26  ;;  %705 = vrot.lane.b32.xlu0 %v3252_v8, %s2853_s26  ;;  %526 = vst.msk [vmem:[#allocation2 + $0x141] sm:$0xff] %vm500_vm3, %v455_v9  ;;  %v3260_v10 = vld [vmem:[#allocation2 + $0x108] sm:$0xff]  ;;  %v3262_v11 = vld [vmem:[#allocation2 + $0x110] sm:$0xff] }
  0xb5   : > { %587 = vst.msk [vmem:[#allocation3 + $0xb0] sm:$0xff] %vm218_vm0, %v3260_v10  ;;  %588 = vst.msk [vmem:[#allocation3 + $0xb8] sm:$0xff] %vm218_vm0, %v3262_v11  ;;  %v3336_v7 = vld [vmem:[#allocation2 + $0x4a] sm:$0xff]  ;;  %v3342_v9 = vld [vmem:[#allocation2 + $0x52] sm:$0xff] }
  0xb7   : > { %v457_v17 = vpop.permute.xlu0 %456  ;;  %v621_v19 = vld [vmem:[#allocation2 + $0x121] sm:$0xff]  ;;  %v459_v23 = vpop.permute.xlu1 %458  ;;  %v622_v28 = vld [vmem:[#allocation2 + $0x129] sm:$0xff] }
  0xb8   : > { %527 = vst.msk [vmem:[#allocation2 + $0x151] sm:$0xff] %vm500_vm3, %v457_v17  ;;  %707 = vrot.lane.b32.xlu1 %v3264_v13, %s2853_s26  ;;  %709 = vrot.lane.b32.xlu0 %v621_v19, %s2853_s26  ;;  %528 = vst.msk [vmem:[#allocation2 + $0x159] sm:$0xff] %vm500_vm3, %v459_v23  ;;  %v3275_v24 = vld [vmem:[#allocation2 + $0x120] sm:$0xff]  ;;  %v3277_v25 = vld [vmem:[#allocation2 + $0x128] sm:$0xff] }
  0xb9   : > { %589 = vst.msk [vmem:[#allocation3 + $0xc0] sm:$0xff] %vm218_vm0, %v3275_v24  ;;  %590 = vst.msk [vmem:[#allocation3 + $0xc8] sm:$0xff] %vm218_vm0, %v3277_v25  ;;  %v3344_v17 = vld [vmem:[#allocation2 + $0x62] sm:$0xff]  ;;  %v799_v19 = vld [vmem:[#allocation2 + $0x6a] sm:$0xff] }
  0xba   : > { %v800_v23 = vld [vmem:[#allocation2 + $0x7a] sm:$0xff] }
  0xbb   : > { %v461_v29 = vpop.permute.xlu0 %460  ;;  %v623_v30 = vld [vmem:[#allocation2 + $0x139] sm:$0xff]  ;;  %v463_v31 = vpop.permute.xlu1 %462  ;;  %v624_v36 = vld [vmem:[#allocation2 + $0x141] sm:$0xff] }
  0xbc   : > { %529 = vst.msk [vmem:[#allocation2 + $0x169] sm:$0xff] %vm500_vm3, %v461_v29  ;;  %711 = vrot.lane.b32.xlu1 %v622_v28, %s2853_s26  ;;  %713 = vrot.lane.b32.xlu0 %v623_v30, %s2853_s26  ;;  %530 = vst.msk [vmem:[#allocation2 + $0x171] sm:$0xff] %vm500_vm3, %v463_v31  ;;  %v3287_v34 = vld [vmem:[#allocation2 + $0x138] sm:$0xff]  ;;  %v3289_v35 = vld [vmem:[#allocation2 + $0x140] sm:$0xff] }
  0xbd   : > { %591 = vst.msk [vmem:[#allocation3 + $0xd0] sm:$0xff] %vm218_vm0, %v3287_v34  ;;  %592 = vst.msk [vmem:[#allocation3 + $0xd8] sm:$0xff] %vm218_vm0, %v3289_v35  ;;  %v801_v28 = vld [vmem:[#allocation2 + $0x82] sm:$0xff]  ;;  %v802_v29 = vld [vmem:[#allocation2 + $0x92] sm:$0xff] }
  0xbe   : > { %v803_v30 = vld [vmem:[#allocation2 + $0x9a] sm:$0xff]  ;;  %v804_v31 = vld [vmem:[#allocation2 + $0xaa] sm:$0xff] }
  0xbf   : > { %v625_v37 = vld [vmem:[#allocation2 + $0x151] sm:$0xff]  ;;  %v465_v40 = vpop.permute.xlu0 %464  ;;  %v467_v41 = vpop.permute.xlu1 %466  ;;  %v626_v46 = vld [vmem:[#allocation2 + $0x159] sm:$0xff] }
  0xc0   : > { %715 = vrot.lane.b32.xlu1 %v624_v36, %s2853_s26  ;;  %717 = vrot.lane.b32.xlu0 %v625_v37, %s2853_s26  ;;  %531 = vst.msk [vmem:[#allocation2 + $0x181] sm:$0xff] %vm500_vm3, %v465_v40  ;;  %532 = vst.msk [vmem:[#allocation2 + $0x189] sm:$0xff] %vm500_vm3, %v467_v41  ;;  %v3299_v42 = vld [vmem:[#allocation2 + $0x150] sm:$0xff]  ;;  %v3301_v43 = vld [vmem:[#allocation2 + $0x158] sm:$0xff] }
  0xc1   : > { %593 = vst.msk [vmem:[#allocation3 + $0xe0] sm:$0xff] %vm218_vm0, %v3299_v42  ;;  %594 = vst.msk [vmem:[#allocation3 + $0xe8] sm:$0xff] %vm218_vm0, %v3301_v43  ;;  %v805_v36 = vld [vmem:[#allocation2 + $0xb2] sm:$0xff]  ;;  %v806_v37 = vld [vmem:[#allocation2 + $0xc2] sm:$0xff] }
  0xc2   : > { %v807_v40 = vld [vmem:[#allocation2 + $0xca] sm:$0xff]  ;;  %v3358_v41 = vld [vmem:[#allocation2 + $0xda] sm:$0xff] }
  0xc3   : > { %v627_v47 = vld [vmem:[#allocation2 + $0x169] sm:$0xff]  ;;  %v662_v48 = vpop.permute.xlu0 %661  ;;  %v664_v49 = vpop.permute.xlu1 %663  ;;  %v628_v54 = vld [vmem:[#allocation2 + $0x171] sm:$0xff] }
  0xc4   : > { %719 = vrot.lane.b32.xlu1 %v626_v46, %s2853_s26  ;;  %721 = vrot.lane.b32.xlu0 %v627_v47, %s2853_s26  ;;  %758 = vst.msk [vmem:[#allocation3] sm:$0xff] %vm757_vm4, %v662_v48  ;;  %759 = vst.msk [vmem:[#allocation3 + $0x8] sm:$0xff] %vm757_vm4, %v664_v49  ;;  %v3311_v52 = vld [vmem:[#allocation2 + $0x168] sm:$0xff]  ;;  %v3313_v53 = vld [vmem:[#allocation2 + $0x170] sm:$0xff] }
  0xc5   : > { %595 = vst.msk [vmem:[#allocation3 + $0xf0] sm:$0xff] %vm218_vm0, %v3311_v52  ;;  %596 = vst.msk [vmem:[#allocation3 + $0xf8] sm:$0xff] %vm218_vm0, %v3313_v53  ;;  %v3363_v46 = vld [vmem:[#allocation2 + $0xe2] sm:$0xff]  ;;  %v3365_v47 = vld [vmem:[#allocation2 + $0xf2] sm:$0xff] }
  0xc6   : > { %v3371_v48 = vld [vmem:[#allocation2 + $0xfa] sm:$0xff]  ;;  %v3373_v49 = vld [vmem:[#allocation2 + $0x10a] sm:$0xff] }
  0xc7   : > { %v855_v58 = vpop.permute.xlu0 %854  ;;  %v857_v59 = vpop.permute.xlu1 %856 }
  0xc8   : > { %723 = vrot.lane.b32.xlu1 %v628_v54, %s2853_s26  ;;  %858 = vrot.lane.b32.xlu0 %v3319_v55, %s2854_s27  ;;  %951 = vst.msk [vmem:[#allocation3] sm:$0xff] %vm950_vm5, %v855_v58  ;;  %952 = vst.msk [vmem:[#allocation3 + $0x8] sm:$0xff] %vm950_vm5, %v857_v59  ;;  %v3379_v54 = vld [vmem:[#allocation2 + $0x112] sm:$0xff]  ;;  %v3381_v58 = vld [vmem:[#allocation2 + $0x122] sm:$0xff] }
  0xc9   : > { %v3387_v59 = vld [vmem:[#allocation2 + $0x12a] sm:$0xff] }
  0xcc   : > { %860 = vrot.lane.b32.xlu1 %v3326_v61, %s2854_s27  ;;  %862 = vrot.lane.b32.xlu0 %v3328_v1, %s2854_s27 }
  0xd0   : > { %864 = vrot.lane.b32.xlu1 %v3334_v3, %s2854_s27  ;;  %866 = vrot.lane.b32.xlu0 %v3336_v7, %s2854_s27 }
  0xd4   : > { %868 = vrot.lane.b32.xlu1 %v3342_v9, %s2854_s27  ;;  %870 = vrot.lane.b32.xlu0 %v3344_v17, %s2854_s27 }
  0xd8   : > { %872 = vrot.lane.b32.xlu1 %v799_v19, %s2854_s27  ;;  %874 = vrot.lane.b32.xlu0 %v800_v23, %s2854_s27  ;;  %v816_v19 = vld [vmem:[#allocation2 + $0x13a] sm:$0xff]  ;;  %v817_v23 = vld [vmem:[#allocation2 + $0x142] sm:$0xff] }
  0xdc   : > { %876 = vrot.lane.b32.xlu1 %v801_v28, %s2854_s27  ;;  %878 = vrot.lane.b32.xlu0 %v802_v29, %s2854_s27  ;;  %v818_v28 = vld [vmem:[#allocation2 + $0x152] sm:$0xff] }
  0xe0   : > { %880 = vrot.lane.b32.xlu1 %v803_v30, %s2854_s27  ;;  %882 = vrot.lane.b32.xlu0 %v804_v31, %s2854_s27  ;;  %v819_v30 = vld [vmem:[#allocation2 + $0x15a] sm:$0xff]  ;;  %v820_v31 = vld [vmem:[#allocation2 + $0x16a] sm:$0xff] }
  0xe4   : > { %884 = vrot.lane.b32.xlu1 %v805_v36, %s2854_s27  ;;  %886 = vrot.lane.b32.xlu0 %v806_v37, %s2854_s27 }
  0xe8   : > { %888 = vrot.lane.b32.xlu1 %v807_v40, %s2854_s27  ;;  %890 = vrot.lane.b32.xlu0 %v3358_v41, %s2854_s27  ;;  %v821_v40 = vld [vmem:[#allocation2 + $0x172] sm:$0xff] }
  0xec   : > { %892 = vrot.lane.b32.xlu1 %v3363_v46, %s2854_s27  ;;  %894 = vrot.lane.b32.xlu0 %v3365_v47, %s2854_s27 }
  0xf0   : > { %896 = vrot.lane.b32.xlu1 %v3371_v48, %s2854_s27  ;;  %898 = vrot.lane.b32.xlu0 %v3373_v49, %s2854_s27 }
  0xf4   : > { %900 = vrot.lane.b32.xlu1 %v3379_v54, %s2854_s27  ;;  %902 = vrot.lane.b32.xlu0 %v3381_v58, %s2854_s27 }
  0xf8   : > { %904 = vrot.lane.b32.xlu1 %v3387_v59, %s2854_s27  ;;  %906 = vrot.lane.b32.xlu0 %v816_v19, %s2854_s27 }
  0xfc   : > { %908 = vrot.lane.b32.xlu1 %v817_v23, %s2854_s27  ;;  %910 = vrot.lane.b32.xlu0 %v818_v28, %s2854_s27 }
  0xfe   : > { %v666_v29 = vpop.permute.xlu0 %665 }
  0xff   : > { %760 = vst.msk [vmem:[#allocation3 + $0x10] sm:$0xff] %vm757_vm4, %v666_v29 }
 0x100   : > { %912 = vrot.lane.b32.xlu1 %v819_v30, %s2854_s27  ;;  %914 = vrot.lane.b32.xlu0 %v820_v31, %s2854_s27 }
 0x102   : > { %v668_v36 = vpop.permute.xlu1 %667  ;;  %v670_v37 = vpop.permute.xlu0 %669 }
 0x103   : > { %761 = vst.msk [vmem:[#allocation3 + $0x18] sm:$0xff] %vm757_vm4, %v668_v36  ;;  %762 = vst.msk [vmem:[#allocation3 + $0x20] sm:$0xff] %vm757_vm4, %v670_v37 }
 0x104   : > { %916 = vrot.lane.b32.xlu1 %v821_v40, %s2854_s27  ;;  %1047 = vrot.lane.b32.xlu0 %v3112_v14, %s2855_s28 }
 0x106   : > { %v672_v19 = vpop.permute.xlu1 %671  ;;  %v674_v23 = vpop.permute.xlu0 %673 }
 0x107   : > { %763 = vst.msk [vmem:[#allocation3 + $0x28] sm:$0xff] %vm757_vm4, %v672_v19  ;;  %764 = vst.msk [vmem:[#allocation3 + $0x30] sm:$0xff] %vm757_vm4, %v674_v23 }
 0x108   : > { %1049 = vrot.lane.b32.xlu1 %v3136_v21, %s2855_s28  ;;  %1051 = vrot.lane.b32.xlu0 %v3120_v15, %s2855_s28 }
 0x10a   : > { %v676_v28 = vpop.permute.xlu1 %675  ;;  %v678_v29 = vpop.permute.xlu0 %677 }
 0x10b   : > { %765 = vst.msk [vmem:[#allocation3 + $0x38] sm:$0xff] %vm757_vm4, %v676_v28  ;;  %766 = vst.msk [vmem:[#allocation3 + $0x40] sm:$0xff] %vm757_vm4, %v678_v29 }
 0x10c   : > { %1053 = vrot.lane.b32.xlu1 %v3138_v22, %s2855_s28  ;;  %1055 = vrot.lane.b32.xlu0 %v3149_v26, %s2855_s28 }
 0x10e   : > { %v680_v14 = vpop.permute.xlu1 %679  ;;  %v682_v30 = vpop.permute.xlu0 %681 }
 0x10f   : > { %767 = vst.msk [vmem:[#allocation3 + $0x48] sm:$0xff] %vm757_vm4, %v680_v14  ;;  %768 = vst.msk [vmem:[#allocation3 + $0x50] sm:$0xff] %vm757_vm4, %v682_v30 }
 0x110   : > { %1057 = vrot.lane.b32.xlu1 %v3151_v27, %s2855_s28  ;;  %1059 = vrot.lane.b32.xlu0 %v3161_v32, %s2855_s28 }
 0x112   : > { %v684_v21 = vpop.permute.xlu1 %683  ;;  %v686_v31 = vpop.permute.xlu0 %685 }
 0x113   : > { %769 = vst.msk [vmem:[#allocation3 + $0x58] sm:$0xff] %vm757_vm4, %v684_v21  ;;  %770 = vst.msk [vmem:[#allocation3 + $0x60] sm:$0xff] %vm757_vm4, %v686_v31 }
 0x114   : > { %1061 = vrot.lane.b32.xlu1 %v3163_v33, %s2855_s28  ;;  %1063 = vrot.lane.b32.xlu0 %v3173_v38, %s2855_s28 }
 0x116   : > { %v688_v36 = vpop.permute.xlu1 %687  ;;  %v690_v37 = vpop.permute.xlu0 %689 }
 0x117   : > { %771 = vst.msk [vmem:[#allocation3 + $0x68] sm:$0xff] %vm757_vm4, %v688_v36  ;;  %772 = vst.msk [vmem:[#allocation3 + $0x70] sm:$0xff] %vm757_vm4, %v690_v37 }
 0x118   : > { %1065 = vrot.lane.b32.xlu1 %v3175_v39, %s2855_s28  ;;  %1067 = vrot.lane.b32.xlu0 %v3185_v44, %s2855_s28 }
 0x11a   : > { %v692_v40 = vpop.permute.xlu1 %691  ;;  %v694_v19 = vpop.permute.xlu0 %693 }
 0x11b   : > { %773 = vst.msk [vmem:[#allocation3 + $0x78] sm:$0xff] %vm757_vm4, %v692_v40  ;;  %774 = vst.msk [vmem:[#allocation3 + $0x80] sm:$0xff] %vm757_vm4, %v694_v19  ;;  %v1013_v19 = vld [vmem:[#allocation2 + $0x180] sm:$0xff] }
 0x11c   : > { %1069 = vrot.lane.b32.xlu1 %v3187_v45, %s2855_s28  ;;  %1071 = vrot.lane.b32.xlu0 %v3197_v50, %s2855_s28 }
 0x11e   : > { %v696_v23 = vpop.permute.xlu1 %695  ;;  %v698_v28 = vpop.permute.xlu0 %697 }
 0x11f   : > { %775 = vst.msk [vmem:[#allocation3 + $0x88] sm:$0xff] %vm757_vm4, %v696_v23  ;;  %776 = vst.msk [vmem:[#allocation3 + $0x90] sm:$0xff] %vm757_vm4, %v698_v28 }
 0x120   : > { %1073 = vrot.lane.b32.xlu1 %v3199_v51, %s2855_s28  ;;  %1075 = vrot.lane.b32.xlu0 %v3209_v56, %s2855_s28 }
 0x122   : > { %v700_v44 = vpop.permute.xlu1 %699  ;;  %v702_v29 = vpop.permute.xlu0 %701 }
 0x123   : > { %777 = vst.msk [vmem:[#allocation3 + $0x98] sm:$0xff] %vm757_vm4, %v700_v44  ;;  %778 = vst.msk [vmem:[#allocation3 + $0xa0] sm:$0xff] %vm757_vm4, %v702_v29  ;;  %v1014_v44 = vld [vmem:[#allocation2 + $0x188] sm:$0xff] }
 0x124   : > { %1077 = vrot.lane.b32.xlu1 %v3211_v57, %s2855_s28  ;;  %1079 = vrot.lane.b32.xlu0 %v3224_v62, %s2855_s28 }
 0x126   : > { %v704_v45 = vpop.permute.xlu1 %703  ;;  %v706_v50 = vpop.permute.xlu0 %705 }
 0x127   : > { %779 = vst.msk [vmem:[#allocation3 + $0xa8] sm:$0xff] %vm757_vm4, %v704_v45  ;;  %780 = vst.msk [vmem:[#allocation3 + $0xb0] sm:$0xff] %vm757_vm4, %v706_v50 }
 0x128   : > { %1081 = vrot.lane.b32.xlu1 %v3226_v63, %s2855_s28  ;;  %1083 = vrot.lane.b32.xlu0 %v3242_v4, %s2855_s28 }
 0x12a   : > { %v708_v51 = vpop.permute.xlu1 %707  ;;  %v710_v56 = vpop.permute.xlu0 %709 }
 0x12b   : > { %781 = vst.msk [vmem:[#allocation3 + $0xb8] sm:$0xff] %vm757_vm4, %v708_v51  ;;  %782 = vst.msk [vmem:[#allocation3 + $0xc0] sm:$0xff] %vm757_vm4, %v710_v56  ;;  %v2177_v56 = vld [vmem:[%s4101_s2 + $0x18] sm:$0xff] }
 0x12c   : > { %1085 = vrot.lane.b32.xlu1 %v3244_v5, %s2855_s28  ;;  %1087 = vrot.lane.b32.xlu0 %v3260_v10, %s2855_s28 }
 0x12e   : > { %v712_v57 = vpop.permute.xlu1 %711  ;;  %v714_v62 = vpop.permute.xlu0 %713 }
 0x12f   : > { %783 = vst.msk [vmem:[#allocation3 + $0xc8] sm:$0xff] %vm757_vm4, %v712_v57  ;;  %784 = vst.msk [vmem:[#allocation3 + $0xd0] sm:$0xff] %vm757_vm4, %v714_v62 }
 0x130   : > { %1089 = vrot.lane.b32.xlu1 %v3262_v11, %s2855_s28  ;;  %1091 = vrot.lane.b32.xlu0 %v3275_v24, %s2855_s28 }
 0x132   : > { %v716_v63 = vpop.permute.xlu1 %715  ;;  %v718_v14 = vpop.permute.xlu0 %717 }
 0x133   : > { %785 = vst.msk [vmem:[#allocation3 + $0xd8] sm:$0xff] %vm757_vm4, %v716_v63  ;;  %786 = vst.msk [vmem:[#allocation3 + $0xe0] sm:$0xff] %vm757_vm4, %v718_v14  ;;  %v2179_v14 = vld [vmem:[%s4101_s2 + $0x28] sm:$0xff] }
 0x134   : > { %1093 = vrot.lane.b32.xlu1 %v3277_v25, %s2855_s28  ;;  %1095 = vrot.lane.b32.xlu0 %v3287_v34, %s2855_s28 }
 0x136   : > { %v720_v30 = vpop.permute.xlu1 %719  ;;  %v722_v21 = vpop.permute.xlu0 %721 }
 0x137   : > { %787 = vst.msk [vmem:[#allocation3 + $0xe8] sm:$0xff] %vm757_vm4, %v720_v30  ;;  %788 = vst.msk [vmem:[#allocation3 + $0xf0] sm:$0xff] %vm757_vm4, %v722_v21 }
 0x138   : > { %1097 = vrot.lane.b32.xlu1 %v3289_v35, %s2855_s28  ;;  %1099 = vrot.lane.b32.xlu0 %v3299_v42, %s2855_s28 }
 0x13a   : > { %v724_v31 = vpop.permute.xlu1 %723  ;;  %v859_v36 = vpop.permute.xlu0 %858 }
 0x13b   : > { %789 = vst.msk [vmem:[#allocation3 + $0xf8] sm:$0xff] %vm757_vm4, %v724_v31 }
 0x13c   : > { %953 = vst.msk [vmem:[#allocation3 + $0x10] sm:$0xff] %vm950_vm5, %v859_v36  ;;  %1101 = vrot.lane.b32.xlu1 %v3301_v43, %s2855_s28  ;;  %1103 = vrot.lane.b32.xlu0 %v3311_v52, %s2855_s28  ;;  %v2181_v36 = vld [vmem:[%s4101_s2 + $0x38] sm:$0xff] }
 0x13e   : > { %v861_v37 = vpop.permute.xlu1 %860  ;;  %v863_v40 = vpop.permute.xlu0 %862 }
 0x13f   : > { %954 = vst.msk [vmem:[#allocation3 + $0x18] sm:$0xff] %vm950_vm5, %v861_v37  ;;  %955 = vst.msk [vmem:[#allocation3 + $0x20] sm:$0xff] %vm950_vm5, %v863_v40 }
 0x140   : > { %1105 = vrot.lane.b32.xlu1 %v3313_v53, %s2855_s28  ;;  %1107 = vrot.lane.b32.xlu0 %v1013_v19, %s2855_s28 }
 0x142   : > { %v865_v23 = vpop.permute.xlu1 %864  ;;  %v867_v28 = vpop.permute.xlu0 %866 }
 0x143   : > { %956 = vst.msk [vmem:[#allocation3 + $0x28] sm:$0xff] %vm950_vm5, %v865_v23  ;;  %957 = vst.msk [vmem:[#allocation3 + $0x30] sm:$0xff] %vm950_vm5, %v867_v28  ;;  %v2182_v23 = vld [vmem:[%s4101_s2 + $0x40] sm:$0xff] }
 0x144   : > { %1109 = vrot.lane.b32.xlu1 %v1014_v44, %s2855_s28  ;;  %1240 = vrot.lane.b32.xlu0 %v3110_v12, %s2856_s29 }
 0x146   : > { %v869_v52 = vpop.permute.xlu1 %868  ;;  %v871_v29 = vpop.permute.xlu0 %870 }
 0x147   : > { %958 = vst.msk [vmem:[#allocation3 + $0x38] sm:$0xff] %vm950_vm5, %v869_v52  ;;  %959 = vst.msk [vmem:[#allocation3 + $0x40] sm:$0xff] %vm950_vm5, %v871_v29 }
 0x148   : > { %1242 = vrot.lane.b32.xlu1 %v3126_v18, %s2856_s29  ;;  %1272 = vrot.lane.b32.xlu0 %v3217_v60, %s2856_s29 }
 0x14a   : > { %v873_v53 = vpop.permute.xlu1 %872  ;;  %v875_v45 = vpop.permute.xlu0 %874 }
 0x14b   : > { %960 = vst.msk [vmem:[#allocation3 + $0x48] sm:$0xff] %vm950_vm5, %v873_v53  ;;  %961 = vst.msk [vmem:[#allocation3 + $0x50] sm:$0xff] %vm950_vm5, %v875_v45 }
 0x14c   : > { %1274 = vrot.lane.b32.xlu1 %v3228_v0, %s2856_s29  ;;  %1433 = vrot.lane.b32.xlu0 %v3319_v55, %s2857_s30 }
 0x14e   : > { %v877_v12 = vpop.permute.xlu1 %876  ;;  %v879_v50 = vpop.permute.xlu0 %878 }
 0x14f   : > { %962 = vst.msk [vmem:[#allocation3 + $0x58] sm:$0xff] %vm950_vm5, %v877_v12  ;;  %963 = vst.msk [vmem:[#allocation3 + $0x60] sm:$0xff] %vm950_vm5, %v879_v50 }
 0x150   : > { %1465 = vrot.lane.b32.xlu1 %v3358_v41, %s2857_s30  ;;  %1435 = vrot.lane.b32.xlu0 %v3326_v61, %s2857_s30 }
 0x152   : > { %v881_v18 = vpop.permute.xlu1 %880  ;;  %v883_v60 = vpop.permute.xlu0 %882 }
 0x153   : > { %964 = vst.msk [vmem:[#allocation3 + $0x68] sm:$0xff] %vm950_vm5, %v881_v18  ;;  %965 = vst.msk [vmem:[#allocation3 + $0x70] sm:$0xff] %vm950_vm5, %v883_v60 }
 0x154   : > { %1467 = vrot.lane.b32.xlu1 %v3363_v46, %s2857_s30  ;;  %1627 = vrot.lane.b32.xlu0 %v3120_v15, %s2858_s5  ;;  %v2174_v15 = vld [vmem:[%s4101_s2] sm:$0xff] }
 0x156   : > { %v885_v0 = vpop.permute.xlu1 %884  ;;  %v887_v55 = vpop.permute.xlu0 %886 }
 0x157   : > { %966 = vst.msk [vmem:[#allocation3 + $0x78] sm:$0xff] %vm950_vm5, %v885_v0  ;;  %967 = vst.msk [vmem:[#allocation3 + $0x80] sm:$0xff] %vm950_vm5, %v887_v55 }
 0x158   : > { %1659 = vrot.lane.b32.xlu1 %v3242_v4, %s2858_s5  ;;  %1629 = vrot.lane.b32.xlu0 %v3138_v22, %s2858_s5  ;;  %v2175_v22 = vld [vmem:[%s4101_s2 + $0x8] sm:$0xff] }
 0x159   : > { %v2799_v4 = vpack.c.bf16 %v2175_v22, %v2174_v15 }
 0x15a   : > { %v889_v61 = vpop.permute.xlu1 %888  ;;  %v891_v41 = vpop.permute.xlu0 %890 }
 0x15b   : > { %968 = vst.msk [vmem:[#allocation3 + $0x88] sm:$0xff] %vm950_vm5, %v889_v61  ;;  %969 = vst.msk [vmem:[#allocation3 + $0x90] sm:$0xff] %vm950_vm5, %v891_v41  ;;  %2800 = vmatprep.subr.bf16.mxu0 %v2799_v4  ;;  %2815 = vmatprep.subr.bf16.mxu1 %v2799_v4 }
 0x15c   : > { %1661 = vrot.lane.b32.xlu1 %v3244_v5, %s2858_s5  ;;  %1820 = vrot.lane.b32.xlu0 %v3122_v16, %s2859_s6  ;;  %v2176_v5 = vld [vmem:[%s4101_s2 + $0x10] sm:$0xff] }
 0x15d   : > { %2802 = vmatpush3.bf16.msra.mxu0 %v2799_v4  ;;  %v2803_v57 = vpack.c.bf16 %v2177_v56, %v2176_v5  ;;  %2820 = vmatpush3.bf16.msra.mxu1 %v2799_v4 }
 0x15e   : > { %v893_v46 = vpop.permute.xlu1 %892  ;;  %v895_v51 = vpop.permute.xlu0 %894 }
 0x15f   : > { %970 = vst.msk [vmem:[#allocation3 + $0x98] sm:$0xff] %vm950_vm5, %v893_v46  ;;  %971 = vst.msk [vmem:[#allocation3 + $0xa0] sm:$0xff] %vm950_vm5, %v895_v51  ;;  %2804 = vmatprep.subr.bf16.mxu0 %v2803_v57  ;;  %2816 = vmatprep.subr.bf16.mxu1 %v2803_v57 }
 0x160   : > { %1852 = vrot.lane.b32.xlu1 %v3234_v2, %s2859_s6  ;;  %1244 = vrot.lane.b32.xlu0 %v3122_v16, %s2856_s29  ;;  %v2178_v16 = vld [vmem:[%s4101_s2 + $0x20] sm:$0xff] }
 0x161   : > { %2806 = vmatpush3.bf16.msra.mxu0 %v2803_v57  ;;  %v2807_v30 = vpack.c.bf16 %v2179_v14, %v2178_v16  ;;  %2821 = vmatpush3.bf16.msra.mxu1 %v2803_v57 }
 0x162   : > { %v897_v62 = vpop.permute.xlu1 %896  ;;  %v899_v63 = vpop.permute.xlu0 %898 }
 0x163   : > { %972 = vst.msk [vmem:[#allocation3 + $0xa8] sm:$0xff] %vm950_vm5, %v897_v62  ;;  %973 = vst.msk [vmem:[#allocation3 + $0xb0] sm:$0xff] %vm950_vm5, %v899_v63  ;;  %2808 = vmatprep.subr.bf16.mxu0 %v2807_v30  ;;  %2817 = vmatprep.subr.bf16.mxu1 %v2807_v30  ;;  %v1777_v63 = vld [vmem:[#allocation2 + $0x129] sm:$0xff] }
 0x164   : > { %1276 = vrot.lane.b32.xlu1 %v3234_v2, %s2856_s29  ;;  %1822 = vrot.lane.b32.xlu0 %v3134_v20, %s2859_s6  ;;  %v2180_v2 = vld [vmem:[%s4101_s2 + $0x30] sm:$0xff] }
 0x165   : > { %2810 = vmatpush3.bf16.msra.mxu0 %v2807_v30  ;;  %v2811_v37 = vpack.c.bf16 %v2181_v36, %v2180_v2  ;;  %2822 = vmatpush3.bf16.msra.mxu1 %v2807_v30  ;;  %v1954_v36 = vld [vmem:[#allocation2 + $0x6a] sm:$0xff] }
 0x166   : > { %v901_v21 = vpop.permute.xlu1 %900  ;;  %v903_v31 = vpop.permute.xlu0 %902 }
 0x167   : > { %974 = vst.msk [vmem:[#allocation3 + $0xb8] sm:$0xff] %vm950_vm5, %v901_v21  ;;  %975 = vst.msk [vmem:[#allocation3 + $0xc0] sm:$0xff] %vm950_vm5, %v903_v31  ;;  %2812 = vmatprep.subr.bf16.mxu0 %v2811_v37  ;;  %2818 = vmatprep.subr.bf16.mxu1 %v2811_v37  ;;  %v1375_v31 = vld [vmem:[#allocation2 + $0x62] sm:$0xff] }
 0x168   : > { %1854 = vrot.lane.b32.xlu1 %v3246_v6, %s2859_s6  ;;  %2013 = vrot.lane.b32.xlu0 %v3328_v1, %s2860_s21 }
 0x169   : > { %2814 = vmatpush3.bf16.msra.mxu0 %v2811_v37  ;;  %2823 = vmatpush3.bf16.msra.mxu1 %v2811_v37 }
 0x16a   : > { %v905_v40 = vpop.permute.xlu1 %904  ;;  %v907_v19 = vpop.permute.xlu0 %906  ;;  %2749 = vmatprep.subr.mxu0 %v2182_v23  ;;  %2819 = vmatprep.subr.mxu1 %v2182_v23 }
 0x16b   : > { %976 = vst.msk [vmem:[#allocation3 + $0xc8] sm:$0xff] %vm950_vm5, %v905_v40  ;;  %977 = vst.msk [vmem:[#allocation3 + $0xd0] sm:$0xff] %vm950_vm5, %v907_v19 }
 0x16c   : > { %2045 = vrot.lane.b32.xlu1 %v3365_v47, %s2860_s21  ;;  %1246 = vrot.lane.b32.xlu0 %v3134_v20, %s2856_s29 }
 0x16d   : > { %2750 = vmatpush3.msra.mxu0 %v2182_v23  ;;  %2824 = vmatpush3.msra.mxu1 %v2182_v23 }
 0x16e   : > { %v909_v28 = vpop.permute.xlu1 %908  ;;  %v911_v44 = vpop.permute.xlu0 %910 }
 0x16f   : > { %978 = vst.msk [vmem:[#allocation3 + $0xd8] sm:$0xff] %vm950_vm5, %v909_v28  ;;  %979 = vst.msk [vmem:[#allocation3 + $0xe0] sm:$0xff] %vm950_vm5, %v911_v44 }
 0x170   : > { %1278 = vrot.lane.b32.xlu1 %v3246_v6, %s2856_s29  ;;  %1437 = vrot.lane.b32.xlu0 %v3328_v1, %s2857_s30 }
 0x172   : > { %v913_v20 = vpop.permute.xlu1 %912  ;;  %v915_v52 = vpop.permute.xlu0 %914 }
 0x173   : > { %980 = vst.msk [vmem:[#allocation3 + $0xe8] sm:$0xff] %vm950_vm5, %v913_v20  ;;  %981 = vst.msk [vmem:[#allocation3 + $0xf0] sm:$0xff] %vm950_vm5, %v915_v52 }
 0x174   : > { %1469 = vrot.lane.b32.xlu1 %v3365_v47, %s2857_s30  ;;  %2015 = vrot.lane.b32.xlu0 %v3334_v3, %s2860_s21 }
 0x176   : > { %v917_v29 = vpop.permute.xlu1 %916  ;;  %v1048_v6 = vpop.permute.xlu0 %1047 }
 0x177   : > { %982 = vst.msk [vmem:[#allocation3 + $0xf8] sm:$0xff] %vm950_vm5, %v917_v29 }
 0x178   : > { %1144 = vst.msk [vmem:[#allocation3] sm:$0xff] %vm1143_vm6, %v1048_v6  ;;  %2047 = vrot.lane.b32.xlu1 %v3371_v48, %s2860_s21  ;;  %1439 = vrot.lane.b32.xlu0 %v3334_v3, %s2857_s30 }
 0x17a   : > { %v1050_v1 = vpop.permute.xlu1 %1049  ;;  %v1052_v53 = vpop.permute.xlu0 %1051 }
 0x17b   : > { %1145 = vst.msk [vmem:[#allocation3 + $0x8] sm:$0xff] %vm1143_vm6, %v1050_v1  ;;  %1146 = vst.msk [vmem:[#allocation3 + $0x10] sm:$0xff] %vm1143_vm6, %v1052_v53  ;;  %v1779_v53 = vld [vmem:[#allocation2 + $0x141] sm:$0xff] }
 0x17c   : > { %1471 = vrot.lane.b32.xlu1 %v3371_v48, %s2857_s30  ;;  %1631 = vrot.lane.b32.xlu0 %v3149_v26, %s2858_s5  ;;  %v1758_v48 = vld [vmem:[#allocation2 + $0x49] sm:$0xff] }
 0x17e   : > { %v1054_v47 = vpop.permute.xlu1 %1053  ;;  %v1056_v45 = vpop.permute.xlu0 %1055 }
 0x17f   : > { %1147 = vst.msk [vmem:[#allocation3 + $0x18] sm:$0xff] %vm1143_vm6, %v1054_v47  ;;  %1148 = vst.msk [vmem:[#allocation3 + $0x20] sm:$0xff] %vm1143_vm6, %v1056_v45  ;;  %v1955_v47 = vld [vmem:[#allocation2 + $0x7a] sm:$0xff] }
 0x180   : > { %1663 = vrot.lane.b32.xlu1 %v3260_v10, %s2858_s5  ;;  %1633 = vrot.lane.b32.xlu0 %v3151_v27, %s2858_s5 }
 0x182   : > { %v1058_v3 = vpop.permute.xlu1 %1057  ;;  %v1060_v12 = vpop.permute.xlu0 %1059 }
 0x183   : > { %1149 = vst.msk [vmem:[#allocation3 + $0x28] sm:$0xff] %vm1143_vm6, %v1058_v3  ;;  %1150 = vst.msk [vmem:[#allocation3 + $0x30] sm:$0xff] %vm1143_vm6, %v1060_v12 }
 0x184   : > { %1665 = vrot.lane.b32.xlu1 %v3262_v11, %s2858_s5  ;;  %1824 = vrot.lane.b32.xlu0 %v1758_v48, %s2859_s6  ;;  %v1759_v11 = vld [vmem:[#allocation2 + $0x51] sm:$0xff] }
 0x186   : > { %v1062_v26 = vpop.permute.xlu1 %1061  ;;  %v1064_v50 = vpop.permute.xlu0 %1063 }
 0x187   : > { %1151 = vst.msk [vmem:[#allocation3 + $0x38] sm:$0xff] %vm1143_vm6, %v1062_v26  ;;  %1152 = vst.msk [vmem:[#allocation3 + $0x40] sm:$0xff] %vm1143_vm6, %v1064_v50 }
 0x188   : > { %1856 = vrot.lane.b32.xlu1 %v3252_v8, %s2859_s6  ;;  %1248 = vrot.lane.b32.xlu0 %v1758_v48, %s2856_s29  ;;  %v1971_v48 = vld [vmem:[#allocation2 + $0x13a] sm:$0xff] }
 0x18a   : > { %v1066_v27 = vpop.permute.xlu1 %1065  ;;  %v1068_v10 = vpop.permute.xlu0 %1067 }
 0x18b   : > { %1153 = vst.msk [vmem:[#allocation3 + $0x48] sm:$0xff] %vm1143_vm6, %v1066_v27  ;;  %1154 = vst.msk [vmem:[#allocation3 + $0x50] sm:$0xff] %vm1143_vm6, %v1068_v10 }
 0x18c   : > { %1280 = vrot.lane.b32.xlu1 %v3252_v8, %s2856_s29  ;;  %1826 = vrot.lane.b32.xlu0 %v1759_v11, %s2859_s6 }
 0x18e   : > { %v1070_v18 = vpop.permute.xlu1 %1069  ;;  %v1072_v60 = vpop.permute.xlu0 %1071 }
 0x18f   : > { %1155 = vst.msk [vmem:[#allocation3 + $0x58] sm:$0xff] %vm1143_vm6, %v1070_v18  ;;  %1156 = vst.msk [vmem:[#allocation3 + $0x60] sm:$0xff] %vm1143_vm6, %v1072_v60  ;;  %v1956_v18 = vld [vmem:[#allocation2 + $0x82] sm:$0xff] }
 0x190   : > { %1858 = vrot.lane.b32.xlu1 %v3264_v13, %s2859_s6  ;;  %2017 = vrot.lane.b32.xlu0 %v3336_v7, %s2860_s21 }
 0x192   : > { %v1074_v0 = vpop.permute.xlu1 %1073  ;;  %v1076_v55 = vpop.permute.xlu0 %1075 }
 0x193   : > { %1157 = vst.msk [vmem:[#allocation3 + $0x68] sm:$0xff] %vm1143_vm6, %v1074_v0  ;;  %1158 = vst.msk [vmem:[#allocation3 + $0x70] sm:$0xff] %vm1143_vm6, %v1076_v55 }
 0x194   : > { %2049 = vrot.lane.b32.xlu1 %v3373_v49, %s2860_s21  ;;  %1250 = vrot.lane.b32.xlu0 %v1759_v11, %s2856_s29 }
 0x196   : > { %v1078_v8 = vpop.permute.xlu1 %1077  ;;  %v1080_v61 = vpop.permute.xlu0 %1079 }
 0x197   : > { %1159 = vst.msk [vmem:[#allocation3 + $0x78] sm:$0xff] %vm1143_vm6, %v1078_v8  ;;  %1160 = vst.msk [vmem:[#allocation3 + $0x80] sm:$0xff] %vm1143_vm6, %v1080_v61  ;;  %v1972_v8 = vld [vmem:[#allocation2 + $0x142] sm:$0xff] }
 0x198   : > { %1282 = vrot.lane.b32.xlu1 %v3264_v13, %s2856_s29  ;;  %1441 = vrot.lane.b32.xlu0 %v3336_v7, %s2857_s30 }
 0x19a   : > { %v1082_v41 = vpop.permute.xlu1 %1081  ;;  %v1084_v15 = vpop.permute.xlu0 %1083 }
 0x19b   : > { %1161 = vst.msk [vmem:[#allocation3 + $0x88] sm:$0xff] %vm1143_vm6, %v1082_v41  ;;  %1162 = vst.msk [vmem:[#allocation3 + $0x90] sm:$0xff] %vm1143_vm6, %v1084_v15 }
 0x19c   : > { %1473 = vrot.lane.b32.xlu1 %v3373_v49, %s2857_s30  ;;  %2019 = vrot.lane.b32.xlu0 %v3342_v9, %s2860_s21 }
 0x19e   : > { %v1086_v22 = vpop.permute.xlu1 %1085  ;;  %v1088_v4 = vpop.permute.xlu0 %1087 }
 0x19f   : > { %1163 = vst.msk [vmem:[#allocation3 + $0x98] sm:$0xff] %vm1143_vm6, %v1086_v22  ;;  %1164 = vst.msk [vmem:[#allocation3 + $0xa0] sm:$0xff] %vm1143_vm6, %v1088_v4  ;;  %v1571_v22 = vld [vmem:[#allocation2 + $0x90] sm:$0xff] }
 0x1a0   : > { %2051 = vrot.lane.b32.xlu1 %v3379_v54, %s2860_s21  ;;  %1443 = vrot.lane.b32.xlu0 %v3342_v9, %s2857_s30 }
 0x1a2   : > { %v1090_v13 = vpop.permute.xlu1 %1089  ;;  %v1092_v7 = vpop.permute.xlu0 %1091 }
 0x1a3   : > { %1165 = vst.msk [vmem:[#allocation3 + $0xa8] sm:$0xff] %vm1143_vm6, %v1090_v13  ;;  %1166 = vst.msk [vmem:[#allocation3 + $0xb0] sm:$0xff] %vm1143_vm6, %v1092_v7  ;;  %v1572_v7 = vld [vmem:[#allocation2 + $0x98] sm:$0xff] }
 0x1a4   : > { %1475 = vrot.lane.b32.xlu1 %v3379_v54, %s2857_s30  ;;  %1635 = vrot.lane.b32.xlu0 %v3161_v32, %s2858_s5  ;;  %v1760_v54 = vld [vmem:[#allocation2 + $0x61] sm:$0xff] }
 0x1a6   : > { %v1094_v49 = vpop.permute.xlu1 %1093  ;;  %v1096_v46 = vpop.permute.xlu0 %1095 }
 0x1a7   : > { %1167 = vst.msk [vmem:[#allocation3 + $0xb8] sm:$0xff] %vm1143_vm6, %v1094_v49  ;;  %1168 = vst.msk [vmem:[#allocation3 + $0xc0] sm:$0xff] %vm1143_vm6, %v1096_v46 }
 0x1a8   : > { %1667 = vrot.lane.b32.xlu1 %v3275_v24, %s2858_s5  ;;  %1637 = vrot.lane.b32.xlu0 %v3163_v33, %s2858_s5  ;;  %v1776_v24 = vld [vmem:[#allocation2 + $0x121] sm:$0xff] }
 0x1aa   : > { %v1098_v9 = vpop.permute.xlu1 %1097  ;;  %v1100_v51 = vpop.permute.xlu0 %1099 }
 0x1ab   : > { %1169 = vst.msk [vmem:[#allocation3 + $0xc8] sm:$0xff] %vm1143_vm6, %v1098_v9  ;;  %1170 = vst.msk [vmem:[#allocation3 + $0xd0] sm:$0xff] %vm1143_vm6, %v1100_v51  ;;  %v1764_v9 = vld [vmem:[#allocation2 + $0x91] sm:$0xff] }
 0x1ac   : > { %1669 = vrot.lane.b32.xlu1 %v3277_v25, %s2858_s5  ;;  %1828 = vrot.lane.b32.xlu0 %v1760_v54, %s2859_s6  ;;  %v1761_v25 = vld [vmem:[#allocation2 + $0x69] sm:$0xff] }
 0x1ae   : > { %v1102_v32 = vpop.permute.xlu1 %1101  ;;  %v1104_v5 = vpop.permute.xlu0 %1103 }
 0x1af   : > { %1171 = vst.msk [vmem:[#allocation3 + $0xd8] sm:$0xff] %vm1143_vm6, %v1102_v32  ;;  %1172 = vst.msk [vmem:[#allocation3 + $0xe0] sm:$0xff] %vm1143_vm6, %v1104_v5 }
 0x1b0   : > { %1860 = vrot.lane.b32.xlu1 %v1776_v24, %s2859_s6  ;;  %1252 = vrot.lane.b32.xlu0 %v1760_v54, %s2856_s29 }
 0x1b2   : > { %v1106_v33 = vpop.permute.xlu1 %1105  ;;  %v1108_v56 = vpop.permute.xlu0 %1107 }
 0x1b3   : > { %1173 = vst.msk [vmem:[#allocation3 + $0xe8] sm:$0xff] %vm1143_vm6, %v1106_v33  ;;  %1174 = vst.msk [vmem:[#allocation3 + $0xf0] sm:$0xff] %vm1143_vm6, %v1108_v56  ;;  %v1781_v56 = vld [vmem:[#allocation2 + $0x159] sm:$0xff] }
 0x1b4   : > { %1284 = vrot.lane.b32.xlu1 %v1776_v24, %s2856_s29  ;;  %1830 = vrot.lane.b32.xlu0 %v1761_v25, %s2859_s6 }
 0x1b6   : > { %v1110_v57 = vpop.permute.xlu1 %1109  ;;  %v1241_v62 = vpop.permute.xlu0 %1240 }
 0x1b7   : > { %1175 = vst.msk [vmem:[#allocation3 + $0xf8] sm:$0xff] %vm1143_vm6, %v1110_v57 }
 0x1b8   : > { %1337 = vst.msk [vmem:[#allocation3] sm:$0xff] %vm1336_vm7, %v1241_v62  ;;  %1862 = vrot.lane.b32.xlu1 %v1777_v63, %s2859_s6  ;;  %2021 = vrot.lane.b32.xlu0 %v3344_v17, %s2860_s21 }
 0x1ba   : > { %v1243_v16 = vpop.permute.xlu1 %1242  ;;  %v1273_v14 = vpop.permute.xlu0 %1272 }
 0x1bb   : > { %1338 = vst.msk [vmem:[#allocation3 + $0x8] sm:$0xff] %vm1336_vm7, %v1243_v16  ;;  %1353 = vst.msk [vmem:[#allocation3 + $0x80] sm:$0xff] %vm1336_vm7, %v1273_v14  ;;  %v1973_v16 = vld [vmem:[#allocation2 + $0x152] sm:$0xff] }
 0x1bc   : > { %2053 = vrot.lane.b32.xlu1 %v3381_v58, %s2860_s21  ;;  %1254 = vrot.lane.b32.xlu0 %v1761_v25, %s2856_s29  ;;  %v1957_v25 = vld [vmem:[#allocation2 + $0x92] sm:$0xff] }
 0x1be   : > { %v1275_v30 = vpop.permute.xlu1 %1274  ;;  %v1434_v21 = vpop.permute.xlu0 %1433 }
 0x1bf   : > { %1354 = vst.msk [vmem:[#allocation3 + $0x88] sm:$0xff] %vm1336_vm7, %v1275_v30 }
 0x1c0   : > { %1530 = vst.msk [vmem:[#allocation3] sm:$0xff] %vm1529_vm8, %v1434_v21  ;;  %1286 = vrot.lane.b32.xlu1 %v1777_v63, %s2856_s29  ;;  %1445 = vrot.lane.b32.xlu0 %v1375_v31, %s2857_s30 }
 0x1c2   : > { %v1466_v17 = vpop.permute.xlu1 %1465  ;;  %v1436_v2 = vpop.permute.xlu0 %1435 }
 0x1c3   : > { %1546 = vst.msk [vmem:[#allocation3 + $0x80] sm:$0xff] %vm1529_vm8, %v1466_v17  ;;  %1531 = vst.msk [vmem:[#allocation3 + $0x8] sm:$0xff] %vm1529_vm8, %v1436_v2  ;;  %v1958_v2 = vld [vmem:[#allocation2 + $0x9a] sm:$0xff] }
 0x1c4   : > { %1477 = vrot.lane.b32.xlu1 %v3381_v58, %s2857_s30  ;;  %2023 = vrot.lane.b32.xlu0 %v1954_v36, %s2860_s21 }
 0x1c6   : > { %v1468_v37 = vpop.permute.xlu1 %1467  ;;  %v1628_v40 = vpop.permute.xlu0 %1627 }
 0x1c7   : > { %1547 = vst.msk [vmem:[#allocation3 + $0x88] sm:$0xff] %vm1529_vm8, %v1468_v37 }
 0x1c8   : > { %1724 = vst.msk [vmem:[#allocation3] sm:$0xff] %vm1723_vm9, %v1628_v40  ;;  %2055 = vrot.lane.b32.xlu1 %v3387_v59, %s2860_s21  ;;  %1447 = vrot.lane.b32.xlu0 %v1954_v36, %s2857_s30 }
 0x1ca   : > { %v1660_v19 = vpop.permute.xlu1 %1659  ;;  %v1630_v23 = vpop.permute.xlu0 %1629 }
 0x1cb   : > { %1740 = vst.msk [vmem:[#allocation3 + $0x80] sm:$0xff] %vm1723_vm9, %v1660_v19  ;;  %1725 = vst.msk [vmem:[#allocation3 + $0x8] sm:$0xff] %vm1723_vm9, %v1630_v23  ;;  %v1974_v19 = vld [vmem:[#allocation2 + $0x15a] sm:$0xff] }
 0x1cc   : > { %1479 = vrot.lane.b32.xlu1 %v3387_v59, %s2857_s30  ;;  %1639 = vrot.lane.b32.xlu0 %v3173_v38, %s2858_s5  ;;  %v1762_v38 = vld [vmem:[#allocation2 + $0x79] sm:$0xff] }
 0x1ce   : > { %v1662_v58 = vpop.permute.xlu1 %1661  ;;  %v1821_v28 = vpop.permute.xlu0 %1820 }
 0x1cf   : > { %1741 = vst.msk [vmem:[#allocation3 + $0x88] sm:$0xff] %vm1723_vm9, %v1662_v58 }
 0x1d0   : > { %1917 = vst.msk [vmem:[#allocation3] sm:$0xff] %vm1916_vm10, %v1821_v28  ;;  %1671 = vrot.lane.b32.xlu1 %v3287_v34, %s2858_s5  ;;  %1641 = vrot.lane.b32.xlu0 %v3175_v39, %s2858_s5  ;;  %v1778_v34 = vld [vmem:[#allocation2 + $0x139] sm:$0xff] }
 0x1d2   : > { %v1853_v44 = vpop.permute.xlu1 %1852  ;;  %v1245_v20 = vpop.permute.xlu0 %1244 }
 0x1d3   : > { %1933 = vst.msk [vmem:[#allocation3 + $0x80] sm:$0xff] %vm1916_vm10, %v1853_v44  ;;  %v1573_v44 = vld [vmem:[#allocation2 + $0xa8] sm:$0xff] }
 0x1d4   : > { %1339 = vst.msk [vmem:[#allocation3 + $0x10] sm:$0xff] %vm1336_vm7, %v1245_v20  ;;  %1673 = vrot.lane.b32.xlu1 %v3289_v35, %s2858_s5  ;;  %1832 = vrot.lane.b32.xlu0 %v1762_v38, %s2859_s6  ;;  %v1763_v35 = vld [vmem:[#allocation2 + $0x81] sm:$0xff] }
 0x1d6   : > { %v1277_v59 = vpop.permute.xlu1 %1276  ;;  %v1823_v52 = vpop.permute.xlu0 %1822 }
 0x1d7   : > { %1355 = vst.msk [vmem:[#allocation3 + $0x90] sm:$0xff] %vm1336_vm7, %v1277_v59  ;;  %v1589_v59 = vld [vmem:[#allocation2 + $0x168] sm:$0xff] }
 0x1d8   : > { %1918 = vst.msk [vmem:[#allocation3 + $0x8] sm:$0xff] %vm1916_vm10, %v1823_v52  ;;  %1864 = vrot.lane.b32.xlu1 %v1778_v34, %s2859_s6  ;;  %1256 = vrot.lane.b32.xlu0 %v1762_v38, %s2856_s29  ;;  %v1574_v52 = vld [vmem:[#allocation2 + $0xb0] sm:$0xff] }
 0x1da   : > { %v1855_v39 = vpop.permute.xlu1 %1854  ;;  %v2014_v29 = vpop.permute.xlu0 %2013 }
 0x1db   : > { %1934 = vst.msk [vmem:[#allocation3 + $0x88] sm:$0xff] %vm1916_vm10, %v1855_v39 }
 0x1dc   : > { %2110 = vst.msk [vmem:[#allocation3] sm:$0xff] %vm2109_vm11, %v2014_v29  ;;  %1288 = vrot.lane.b32.xlu1 %v1778_v34, %s2856_s29  ;;  %1834 = vrot.lane.b32.xlu0 %v1763_v35, %s2859_s6  ;;  %v1590_v29 = vld [vmem:[#allocation2 + $0x170] sm:$0xff] }
 0x1de   : > { %v2046_v6 = vpop.permute.xlu1 %2045  ;;  %v1247_v1 = vpop.permute.xlu0 %1246 }
 0x1df   : > { %2126 = vst.msk [vmem:[#allocation3 + $0x80] sm:$0xff] %vm2109_vm11, %v2046_v6 }
 0x1e0   : > { %1340 = vst.msk [vmem:[#allocation3 + $0x18] sm:$0xff] %vm1336_vm7, %v1247_v1  ;;  %1866 = vrot.lane.b32.xlu1 %v1779_v53, %s2859_s6  ;;  %2025 = vrot.lane.b32.xlu0 %v1955_v47, %s2860_s21 }
 0x1e2   : > { %v1279_v45 = vpop.permute.xlu1 %1278  ;;  %v1438_v3 = vpop.permute.xlu0 %1437 }
 0x1e3   : > { %v2142_v12 = vld [vmem:[#allocation3] sm:$0xff]  ;;  %1356 = vst.msk [vmem:[#allocation3 + $0x98] sm:$0xff] %vm1336_vm7, %v1279_v45 }
 0x1e4   : > { %1532 = vst.msk [vmem:[#allocation3 + $0x10] sm:$0xff] %vm1529_vm8, %v1438_v3  ;;  %2751 = vmatprep.mubr.msk.f32.mxu0 %vm2190_vm12, %v2142_v12  ;;  %2057 = vrot.lane.b32.xlu1 %v1971_v48, %s2860_s21  ;;  %v1767_v3 = vld [vmem:[#allocation2 + $0xb1] sm:$0xff] }
 0x1e5   : > { %1258 = vrot.lane.b32.xlu0 %v1763_v35, %s2856_s29  ;;  %v1766_v35 = vld [vmem:[#allocation2 + $0xa9] sm:$0xff] }
 0x1e6   : > { %v1470_v26 = vpop.permute.xlu1 %1469  ;;  %v2016_v50 = vpop.permute.xlu0 %2015  ;;  %v2158_v27 = vld [vmem:[#allocation3 + $0x80] sm:$0xff] }
 0x1e7   : > { %1548 = vst.msk [vmem:[#allocation3 + $0x90] sm:$0xff] %vm1529_vm8, %v1470_v26  ;;  %2775 = vmatprep.mubr.msk.f32.mxu1 %vm2190_vm12, %v2158_v27  ;;  %v1783_v26 = vld [vmem:[#allocation2 + $0x171] sm:$0xff] }
 0x1e8   : > { %2111 = vst.msk [vmem:[#allocation3 + $0x8] sm:$0xff] %vm2109_vm11, %v2016_v50  ;;  %1290 = vrot.lane.b32.xlu1 %v1779_v53, %s2856_s29  ;;  %v1782_v53 = vld [vmem:[#allocation2 + $0x169] sm:$0xff] }
 0x1e9   : > { %1449 = vrot.lane.b32.xlu0 %v1955_v47, %s2857_s30  ;;  %v1959_v50 = vld [vmem:[#allocation2 + $0xaa] sm:$0xff] }
 0x1ea   : > { %v2048_v10 = vpop.permute.xlu1 %2047  ;;  %v1440_v11 = vpop.permute.xlu0 %1439 }
 0x1eb   : > { %2127 = vst.msk [vmem:[#allocation3 + $0x88] sm:$0xff] %vm2109_vm11, %v2048_v10 }
 0x1ec   : > { %1533 = vst.msk [vmem:[#allocation3 + $0x18] sm:$0xff] %vm1529_vm8, %v1440_v11  ;;  %1481 = vrot.lane.b32.xlu1 %v1971_v48, %s2857_s30 }
 0x1ed   : > { %2027 = vrot.lane.b32.xlu0 %v1956_v18, %s2860_s21 }
 0x1ee   : > { %v1472_v60 = vpop.permute.xlu1 %1471  ;;  %v1632_v0 = vpop.permute.xlu0 %1631 }
 0x1ef   : > { %v2143_v55 = vld [vmem:[#allocation3 + $0x8] sm:$0xff]  ;;  %1549 = vst.msk [vmem:[#allocation3 + $0x98] sm:$0xff] %vm1529_vm8, %v1472_v60 }
 0x1f0   : > { %1726 = vst.msk [vmem:[#allocation3 + $0x10] sm:$0xff] %vm1723_vm9, %v1632_v0  ;;  %2752 = vmatmul.mubr.msk.f32.vlgmr.msra.gmra.mrb[0].mxu0 %vm2190_vm12, %v2143_v55  ;;  %2059 = vrot.lane.b32.xlu1 %v1972_v8, %s2860_s21 }
 0x1f1   : > { %1451 = vrot.lane.b32.xlu0 %v1956_v18, %s2857_s30  ;;  %v1975_v18 = vld [vmem:[#allocation2 + $0x16a] sm:$0xff] }
 0x1f2   : > { %v1664_v61 = vpop.permute.xlu1 %1663  ;;  %v1634_v41 = vpop.permute.xlu0 %1633  ;;  %v2159_v15 = vld [vmem:[#allocation3 + $0x88] sm:$0xff] }
 0x1f3   : > { %1742 = vst.msk [vmem:[#allocation3 + $0x90] sm:$0xff] %vm1723_vm9, %v1664_v61  ;;  %1727 = vst.msk [vmem:[#allocation3 + $0x18] sm:$0xff] %vm1723_vm9, %v1634_v41  ;;  %2776 = vmatmul.mubr.msk.f32.vlgmr.msra.gmra.mrb[0].mxu1 %vm2190_vm12, %v2159_v15  ;;  %v1960_v41 = vld [vmem:[#allocation2 + $0xb2] sm:$0xff] }
 0x1f4   : > { %1483 = vrot.lane.b32.xlu1 %v1972_v8, %s2857_s30 }
 0x1f5   : > { %1643 = vrot.lane.b32.xlu0 %v1571_v22, %s2858_s5 }
 0x1f6   : > { %v1666_v4 = vpop.permute.xlu1 %1665  ;;  %v1825_v13 = vpop.permute.xlu0 %1824 }
 0x1f7   : > { %1743 = vst.msk [vmem:[#allocation3 + $0x98] sm:$0xff] %vm1723_vm9, %v1666_v4 }
 0x1f8   : > { %1919 = vst.msk [vmem:[#allocation3 + $0x10] sm:$0xff] %vm1916_vm10, %v1825_v13  ;;  %1675 = vrot.lane.b32.xlu1 %v3299_v42, %s2858_s5  ;;  %v1780_v42 = vld [vmem:[#allocation2 + $0x151] sm:$0xff] }
 0x1f9   : > { %1645 = vrot.lane.b32.xlu0 %v1572_v7, %s2858_s5  ;;  %v1976_v13 = vld [vmem:[#allocation2 + $0x172] sm:$0xff] }
 0x1fa   : > { %v1857_v49 = vpop.permute.xlu1 %1856  ;;  %v1249_v46 = vpop.permute.xlu0 %1248 }
 0x1fb   : > { %1935 = vst.msk [vmem:[#allocation3 + $0x90] sm:$0xff] %vm1916_vm10, %v1857_v49 }
 0x1fc   : > { %1341 = vst.msk [vmem:[#allocation3 + $0x20] sm:$0xff] %vm1336_vm7, %v1249_v46  ;;  %1677 = vrot.lane.b32.xlu1 %v3301_v43, %s2858_s5  ;;  %v1765_v43 = vld [vmem:[#allocation2 + $0x99] sm:$0xff] }
 0x1fd   : > { %1836 = vrot.lane.b32.xlu0 %v1764_v9, %s2859_s6 }
 0x1fe   : > { %v1281_v51 = vpop.permute.xlu1 %1280  ;;  %v1827_v54 = vpop.permute.xlu0 %1826 }
 0x1ff   : > { %1357 = vst.msk [vmem:[#allocation3 + $0xa0] sm:$0xff] %vm1336_vm7, %v1281_v51 }
 0x200   : > { %1920 = vst.msk [vmem:[#allocation3 + $0x18] sm:$0xff] %vm1916_vm10, %v1827_v54  ;;  %1868 = vrot.lane.b32.xlu1 %v1780_v42, %s2859_s6 }
 0x201   : > { %1260 = vrot.lane.b32.xlu0 %v1764_v9, %s2856_s29  ;;  %v1575_v9 = vld [vmem:[#allocation2 + $0xc0] sm:$0xff] }
 0x202   : > { %v1859_v32 = vpop.permute.xlu1 %1858  ;;  %v2018_v5 = vpop.permute.xlu0 %2017 }
 0x203   : > { %1936 = vst.msk [vmem:[#allocation3 + $0x98] sm:$0xff] %vm1916_vm10, %v1859_v32  ;;  %v1576_v32 = vld [vmem:[#allocation2 + $0xc8] sm:$0xff] }
 0x204   : > { %2112 = vst.msk [vmem:[#allocation3 + $0x10] sm:$0xff] %vm2109_vm11, %v2018_v5  ;;  %1292 = vrot.lane.b32.xlu1 %v1780_v42, %s2856_s29  ;;  %v1591_v42 = vld [vmem:[#allocation2 + $0x180] sm:$0xff] }
 0x205   : > { %1838 = vrot.lane.b32.xlu0 %v1765_v43, %s2859_s6 }
 0x206   : > { %v2050_v24 = vpop.permute.xlu1 %2049  ;;  %v1251_v33 = vpop.permute.xlu0 %1250 }
 0x207   : > { %2128 = vst.msk [vmem:[#allocation3 + $0x90] sm:$0xff] %vm2109_vm11, %v2050_v24  ;;  %v1592_v24 = vld [vmem:[#allocation2 + $0x188] sm:$0xff] }
 0x208   : > { %1342 = vst.msk [vmem:[#allocation3 + $0x28] sm:$0xff] %vm1336_vm7, %v1251_v33  ;;  %1870 = vrot.lane.b32.xlu1 %v1781_v56, %s2859_s6  ;;  %v1768_v33 = vld [vmem:[#allocation2 + $0xc1] sm:$0xff] }
 0x209   : > { %2029 = vrot.lane.b32.xlu0 %v1957_v25, %s2860_s21 }
 0x20a   : > { %v1283_v57 = vpop.permute.xlu1 %1282  ;;  %v1442_v62 = vpop.permute.xlu0 %1441 }
 0x20b   : > { %v2144_v63 = vld [vmem:[#allocation3 + $0x10] sm:$0xff]  ;;  %1358 = vst.msk [vmem:[#allocation3 + $0xa8] sm:$0xff] %vm1336_vm7, %v1283_v57 }
 0x20c   : > { %1534 = vst.msk [vmem:[#allocation3 + $0x20] sm:$0xff] %vm1529_vm8, %v1442_v62  ;;  %2754 = vmatprep.mubr.msk.f32.mxu0 %vm2190_vm12, %v2144_v63  ;;  %2061 = vrot.lane.b32.xlu1 %v1973_v16, %s2860_s21  ;;  %v1784_v57 = vld [vmem:[#allocation2 + $0x181] sm:$0xff] }
 0x20d   : > { %1262 = vrot.lane.b32.xlu0 %v1765_v43, %s2856_s29 }
 0x20e   : > { %v1474_v14 = vpop.permute.xlu1 %1473  ;;  %v2020_v30 = vpop.permute.xlu0 %2019  ;;  %v2160_v21 = vld [vmem:[#allocation3 + $0x90] sm:$0xff] }
 0x20f   : > { %1550 = vst.msk [vmem:[#allocation3 + $0xa0] sm:$0xff] %vm1529_vm8, %v1474_v14  ;;  %2778 = vmatprep.mubr.msk.f32.mxu1 %vm2190_vm12, %v2160_v21  ;;  %v1785_v21 = vld [vmem:[#allocation2 + $0x189] sm:$0xff] }
 0x210   : > { %2113 = vst.msk [vmem:[#allocation3 + $0x18] sm:$0xff] %vm2109_vm11, %v2020_v30  ;;  %1294 = vrot.lane.b32.xlu1 %v1781_v56, %s2856_s29 }
 0x211   : > { %1453 = vrot.lane.b32.xlu0 %v1957_v25, %s2857_s30 }
 0x212   : > { %v2052_v31 = vpop.permute.xlu1 %2051  ;;  %v1444_v17 = vpop.permute.xlu0 %1443 }
 0x213   : > { %2129 = vst.msk [vmem:[#allocation3 + $0x98] sm:$0xff] %vm2109_vm11, %v2052_v31  ;;  %v1961_v31 = vld [vmem:[#allocation2 + $0xc2] sm:$0xff] }
 0x214   : > { %1535 = vst.msk [vmem:[#allocation3 + $0x28] sm:$0xff] %vm1529_vm8, %v1444_v17  ;;  %1485 = vrot.lane.b32.xlu1 %v1973_v16, %s2857_s30  ;;  %v1769_v16 = vld [vmem:[#allocation2 + $0xc9] sm:$0xff] }
 0x215   : > { %2031 = vrot.lane.b32.xlu0 %v1958_v2, %s2860_s21 }
 0x216   : > { %v1476_v36 = vpop.permute.xlu1 %1475  ;;  %v1636_v37 = vpop.permute.xlu0 %1635 }
 0x217   : > { %v2145_v40 = vld [vmem:[#allocation3 + $0x18] sm:$0xff]  ;;  %1551 = vst.msk [vmem:[#allocation3 + $0xa8] sm:$0xff] %vm1529_vm8, %v1476_v36 }
 0x218   : > { %1728 = vst.msk [vmem:[#allocation3 + $0x20] sm:$0xff] %vm1723_vm9, %v1636_v37  ;;  %2755 = vmatmul.mubr.msk.f32.gmra.mrb[2].mxu0 %vm2190_vm12, %v2145_v40  ;;  %2063 = vrot.lane.b32.xlu1 %v1974_v19, %s2860_s21  ;;  %v1977_v37 = vld [vmem:[#allocation2 + $0x182] sm:$0xff] }
 0x219   : > { %1455 = vrot.lane.b32.xlu0 %v1958_v2, %s2857_s30 }
 0x21a   : > { %v1668_v23 = vpop.permute.xlu1 %1667  ;;  %v1638_v58 = vpop.permute.xlu0 %1637  ;;  %v2161_v28 = vld [vmem:[#allocation3 + $0x98] sm:$0xff] }
 0x21b   : > { %1744 = vst.msk [vmem:[#allocation3 + $0xa0] sm:$0xff] %vm1723_vm9, %v1668_v23  ;;  %1729 = vst.msk [vmem:[#allocation3 + $0x28] sm:$0xff] %vm1723_vm9, %v1638_v58  ;;  %2779 = vmatmul.mubr.msk.f32.gmra.mrb[2].mxu1 %vm2190_vm12, %v2161_v28 }
 0x21c   : > { %1487 = vrot.lane.b32.xlu1 %v1974_v19, %s2857_s30 }
 0x21d   : > { %1647 = vrot.lane.b32.xlu0 %v1573_v44, %s2858_s5  ;;  %v1962_v44 = vld [vmem:[#allocation2 + $0xca] sm:$0xff] }
 0x21e   : > { %v1670_v20 = vpop.permute.xlu1 %1669  ;;  %v1829_v38 = vpop.permute.xlu0 %1828 }
 0x21f   : > { %1745 = vst.msk [vmem:[#allocation3 + $0xa8] sm:$0xff] %vm1723_vm9, %v1670_v20 }
 0x220   : > { %1921 = vst.msk [vmem:[#allocation3 + $0x20] sm:$0xff] %vm1916_vm10, %v1829_v38  ;;  %1679 = vrot.lane.b32.xlu1 %v1589_v59, %s2858_s5 }
 0x221   : > { %1649 = vrot.lane.b32.xlu0 %v1574_v52, %s2858_s5  ;;  %v1978_v52 = vld [vmem:[#allocation2 + $0x18a] sm:$0xff] }
 0x222   : > { %v1861_v34 = vpop.permute.xlu1 %1860  ;;  %v1253_v39 = vpop.permute.xlu0 %1252 }
 0x223   : > { %1937 = vst.msk [vmem:[#allocation3 + $0xa0] sm:$0xff] %vm1916_vm10, %v1861_v34 }
 0x224   : > { %1343 = vst.msk [vmem:[#allocation3 + $0x30] sm:$0xff] %vm1336_vm7, %v1253_v39  ;;  %1681 = vrot.lane.b32.xlu1 %v1590_v29, %s2858_s5 }
 0x225   : > { %1840 = vrot.lane.b32.xlu0 %v1766_v35, %s2859_s6 }
 0x226   : > { %v1285_v6 = vpop.permute.xlu1 %1284  ;;  %v1831_v1 = vpop.permute.xlu0 %1830 }
 0x227   : > { %1359 = vst.msk [vmem:[#allocation3 + $0xb0] sm:$0xff] %vm1336_vm7, %v1285_v6  ;;  %v1593_v6 = vld [vmem:[#allocation2 + $0x198] sm:$0xff] }
 0x228   : > { %1922 = vst.msk [vmem:[#allocation3 + $0x28] sm:$0xff] %vm1916_vm10, %v1831_v1  ;;  %1872 = vrot.lane.b32.xlu1 %v1782_v53, %s2859_s6 }
 0x229   : > { %1264 = vrot.lane.b32.xlu0 %v1766_v35, %s2856_s29  ;;  %v1577_v35 = vld [vmem:[#allocation2 + $0xd8] sm:$0xff] }
 0x22a   : > { %v1863_v47 = vpop.permute.xlu1 %1862  ;;  %v2022_v45 = vpop.permute.xlu0 %2021 }
 0x22b   : > { %1938 = vst.msk [vmem:[#allocation3 + $0xa8] sm:$0xff] %vm1916_vm10, %v1863_v47  ;;  %v1578_v47 = vld [vmem:[#allocation2 + $0xe0] sm:$0xff] }
 0x22c   : > { %2114 = vst.msk [vmem:[#allocation3 + $0x20] sm:$0xff] %vm2109_vm11, %v2022_v45  ;;  %1296 = vrot.lane.b32.xlu1 %v1782_v53, %s2856_s29  ;;  %v1594_v45 = vld [vmem:[#allocation2 + $0x1a0] sm:$0xff] }
 0x22d   : > { %1842 = vrot.lane.b32.xlu0 %v1767_v3, %s2859_s6 }
 0x22e   : > { %v2054_v12 = vpop.permute.xlu1 %2053  ;;  %v1255_v48 = vpop.permute.xlu0 %1254 }
 0x22f   : > { %2130 = vst.msk [vmem:[#allocation3 + $0xa0] sm:$0xff] %vm2109_vm11, %v2054_v12 }
 0x230   : > { %1344 = vst.msk [vmem:[#allocation3 + $0x38] sm:$0xff] %vm1336_vm7, %v1255_v48  ;;  %1874 = vrot.lane.b32.xlu1 %v1783_v26, %s2859_s6  ;;  %v1770_v48 = vld [vmem:[#allocation2 + $0xd9] sm:$0xff] }
 0x231   : > { %2033 = vrot.lane.b32.xlu0 %v1959_v50, %s2860_s21 }
 0x232   : > { %v1287_v27 = vpop.permute.xlu1 %1286  ;;  %v1446_v10 = vpop.permute.xlu0 %1445 }
 0x233   : > { %v2146_v11 = vld [vmem:[#allocation3 + $0x20] sm:$0xff]  ;;  %1360 = vst.msk [vmem:[#allocation3 + $0xb8] sm:$0xff] %vm1336_vm7, %v1287_v27 }
 0x234   : > { %1536 = vst.msk [vmem:[#allocation3 + $0x30] sm:$0xff] %vm1529_vm8, %v1446_v10  ;;  %2757 = vmatprep.mubr.msk.f32.mxu0 %vm2190_vm12, %v2146_v11  ;;  %2065 = vrot.lane.b32.xlu1 %v1975_v18, %s2860_s21  ;;  %v1771_v10 = vld [vmem:[#allocation2 + $0xe1] sm:$0xff] }
 0x235   : > { %1266 = vrot.lane.b32.xlu0 %v1767_v3, %s2856_s29  ;;  %v1787_v11 = vld [vmem:[#allocation2 + $0x1a1] sm:$0xff] }
 0x236   : > { %v1478_v60 = vpop.permute.xlu1 %1477  ;;  %v2024_v0 = vpop.permute.xlu0 %2023  ;;  %v2162_v55 = vld [vmem:[#allocation3 + $0xa0] sm:$0xff] }
 0x237   : > { %1552 = vst.msk [vmem:[#allocation3 + $0xb0] sm:$0xff] %vm1529_vm8, %v1478_v60  ;;  %2781 = vmatprep.mubr.msk.f32.mxu1 %vm2190_vm12, %v2162_v55  ;;  %v1979_v55 = vld [vmem:[#allocation2 + $0x19a] sm:$0xff] }
 0x238   : > { %2115 = vst.msk [vmem:[#allocation3 + $0x28] sm:$0xff] %vm2109_vm11, %v2024_v0  ;;  %1298 = vrot.lane.b32.xlu1 %v1783_v26, %s2856_s29  ;;  %v1786_v26 = vld [vmem:[#allocation2 + $0x199] sm:$0xff] }
 0x239   : > { %1457 = vrot.lane.b32.xlu0 %v1959_v50, %s2857_s30  ;;  %v1963_v0 = vld [vmem:[#allocation2 + $0xda] sm:$0xff] }
 0x23a   : > { %v2056_v8 = vpop.permute.xlu1 %2055  ;;  %v1448_v61 = vpop.permute.xlu0 %1447 }
 0x23b   : > { %2131 = vst.msk [vmem:[#allocation3 + $0xa8] sm:$0xff] %vm2109_vm11, %v2056_v8 }
 0x23c   : > { %1537 = vst.msk [vmem:[#allocation3 + $0x38] sm:$0xff] %vm1529_vm8, %v1448_v61  ;;  %1489 = vrot.lane.b32.xlu1 %v1975_v18, %s2857_s30 }
 0x23d   : > { %2035 = vrot.lane.b32.xlu0 %v1960_v41, %s2860_s21 }
 0x23e   : > { %v1480_v15 = vpop.permute.xlu1 %1479  ;;  %v1640_v22 = vpop.permute.xlu0 %1639 }
 0x23f   : > { %v2147_v4 = vld [vmem:[#allocation3 + $0x28] sm:$0xff]  ;;  %1553 = vst.msk [vmem:[#allocation3 + $0xb8] sm:$0xff] %vm1529_vm8, %v1480_v15  ;;  %v1980_v15 = vld [vmem:[#allocation2 + $0x1a2] sm:$0xff] }
 0x240   : > { %1730 = vst.msk [vmem:[#allocation3 + $0x30] sm:$0xff] %vm1723_vm9, %v1640_v22  ;;  %2758 = vmatmul.mubr.msk.f32.gmra.mrb[4].mxu0 %vm2190_vm12, %v2147_v4  ;;  %2067 = vrot.lane.b32.xlu1 %v1976_v13, %s2860_s21 }
 0x241   : > { %1459 = vrot.lane.b32.xlu0 %v1960_v41, %s2857_s30  ;;  %v1964_v41 = vld [vmem:[#allocation2 + $0xe2] sm:$0xff] }
 0x242   : > { %v1672_v7 = vpop.permute.xlu1 %1671  ;;  %v1642_v49 = vpop.permute.xlu0 %1641  ;;  %v2163_v46 = vld [vmem:[#allocation3 + $0xa8] sm:$0xff] }
 0x243   : > { %1746 = vst.msk [vmem:[#allocation3 + $0xb0] sm:$0xff] %vm1723_vm9, %v1672_v7  ;;  %1731 = vst.msk [vmem:[#allocation3 + $0x38] sm:$0xff] %vm1723_vm9, %v1642_v49  ;;  %2782 = vmatmul.mubr.msk.f32.gmra.mrb[4].mxu1 %vm2190_vm12, %v2163_v46 }
 0x244   : > { %1491 = vrot.lane.b32.xlu1 %v1976_v13, %s2857_s30 }
 0x245   : > { %1651 = vrot.lane.b32.xlu0 %v1575_v9, %s2858_s5 }
 0x246   : > { %v1674_v51 = vpop.permute.xlu1 %1673  ;;  %v1833_v54 = vpop.permute.xlu0 %1832 }
 0x247   : > { %1747 = vst.msk [vmem:[#allocation3 + $0xb8] sm:$0xff] %vm1723_vm9, %v1674_v51 }
 0x248   : > { %1923 = vst.msk [vmem:[#allocation3 + $0x30] sm:$0xff] %vm1916_vm10, %v1833_v54  ;;  %1683 = vrot.lane.b32.xlu1 %v1591_v42, %s2858_s5 }
 0x249   : > { %1653 = vrot.lane.b32.xlu0 %v1576_v32, %s2858_s5 }
 0x24a   : > { %v1865_v5 = vpop.permute.xlu1 %1864  ;;  %v1257_v43 = vpop.permute.xlu0 %1256 }
 0x24b   : > { %1939 = vst.msk [vmem:[#allocation3 + $0xb0] sm:$0xff] %vm1916_vm10, %v1865_v5 }
 0x24c   : > { %1345 = vst.msk [vmem:[#allocation3 + $0x40] sm:$0xff] %vm1336_vm7, %v1257_v43  ;;  %1685 = vrot.lane.b32.xlu1 %v1592_v24, %s2858_s5 }
 0x24d   : > { %1844 = vrot.lane.b32.xlu0 %v1768_v33, %s2859_s6 }
 0x24e   : > { %v1289_v56 = vpop.permute.xlu1 %1288  ;;  %v1835_v25 = vpop.permute.xlu0 %1834 }
 0x24f   : > { %1361 = vst.msk [vmem:[#allocation3 + $0xc0] sm:$0xff] %vm1336_vm7, %v1289_v56 }
 0x250   : > { %1924 = vst.msk [vmem:[#allocation3 + $0x38] sm:$0xff] %vm1916_vm10, %v1835_v25  ;;  %1876 = vrot.lane.b32.xlu1 %v1784_v57, %s2859_s6 }
 0x251   : > { %1268 = vrot.lane.b32.xlu0 %v1768_v33, %s2856_s29 }
 0x252   : > { %v1867_v62 = vpop.permute.xlu1 %1866  ;;  %v2026_v63 = vpop.permute.xlu0 %2025 }
 0x253   : > { %1940 = vst.msk [vmem:[#allocation3 + $0xb8] sm:$0xff] %vm1916_vm10, %v1867_v62 }
 0x254   : > { %2116 = vst.msk [vmem:[#allocation3 + $0x30] sm:$0xff] %vm2109_vm11, %v2026_v63  ;;  %1300 = vrot.lane.b32.xlu1 %v1784_v57, %s2856_s29 }
 0x255   : > { %1846 = vrot.lane.b32.xlu0 %v1769_v16, %s2859_s6 }
 0x256   : > { %v2058_v14 = vpop.permute.xlu1 %2057 }
 0x257   : > { %v1259_v30 = vpop.permute.xlu0 %1258  ;;  %2132 = vst.msk [vmem:[#allocation3 + $0xb0] sm:$0xff] %vm2109_vm11, %v2058_v14 }
 0x258   : > { %1346 = vst.msk [vmem:[#allocation3 + $0x48] sm:$0xff] %vm1336_vm7, %v1259_v30  ;;  %1878 = vrot.lane.b32.xlu1 %v1785_v21, %s2859_s6 }
 0x259   : > { %2037 = vrot.lane.b32.xlu0 %v1961_v31, %s2860_s21 }
 0x25a   : > { %v1291_v17 = vpop.permute.xlu1 %1290 }
 0x25b   : > { %v1450_v2 = vpop.permute.xlu0 %1449  ;;  %v2148_v36 = vld [vmem:[#allocation3 + $0x30] sm:$0xff]  ;;  %1362 = vst.msk [vmem:[#allocation3 + $0xc8] sm:$0xff] %vm1336_vm7, %v1291_v17 }
 0x25c   : > { %1538 = vst.msk [vmem:[#allocation3 + $0x40] sm:$0xff] %vm1529_vm8, %v1450_v2  ;;  %2760 = vmatprep.mubr.msk.f32.mxu0 %vm2190_vm12, %v2148_v36  ;;  %2069 = vrot.lane.b32.xlu1 %v1977_v37, %s2860_s21 }
 0x25d   : > { %1270 = vrot.lane.b32.xlu0 %v1769_v16, %s2856_s29 }
 0x25e   : > { %v1482_v40 = vpop.permute.xlu1 %1481  ;;  %v2164_v23 = vld [vmem:[#allocation3 + $0xb0] sm:$0xff] }
 0x25f   : > { %v2028_v19 = vpop.permute.xlu0 %2027  ;;  %1554 = vst.msk [vmem:[#allocation3 + $0xc0] sm:$0xff] %vm1529_vm8, %v1482_v40  ;;  %2784 = vmatprep.mubr.msk.f32.mxu1 %vm2190_vm12, %v2164_v23 }
 0x260   : > { %2117 = vst.msk [vmem:[#allocation3 + $0x38] sm:$0xff] %vm2109_vm11, %v2028_v19  ;;  %1302 = vrot.lane.b32.xlu1 %v1785_v21, %s2856_s29 }
 0x261   : > { %1461 = vrot.lane.b32.xlu0 %v1961_v31, %s2857_s30 }
 0x262   : > { %v2060_v58 = vpop.permute.xlu1 %2059 }
 0x263   : > { %v1452_v28 = vpop.permute.xlu0 %1451  ;;  %2133 = vst.msk [vmem:[#allocation3 + $0xb8] sm:$0xff] %vm2109_vm11, %v2060_v58 }
 0x264   : > { %1539 = vst.msk [vmem:[#allocation3 + $0x48] sm:$0xff] %vm1529_vm8, %v1452_v28  ;;  %1493 = vrot.lane.b32.xlu1 %v1977_v37, %s2857_s30 }
 0x265   : > { %2039 = vrot.lane.b32.xlu0 %v1962_v44, %s2860_s21 }
 0x266   : > { %v1484_v20 = vpop.permute.xlu1 %1483 }
 0x267   : > { %v1644_v38 = vpop.permute.xlu0 %1643  ;;  %v2149_v59 = vld [vmem:[#allocation3 + $0x38] sm:$0xff]  ;;  %1555 = vst.msk [vmem:[#allocation3 + $0xc8] sm:$0xff] %vm1529_vm8, %v1484_v20 }
 0x268   : > { %1732 = vst.msk [vmem:[#allocation3 + $0x40] sm:$0xff] %vm1723_vm9, %v1644_v38  ;;  %2761 = vmatmul.mubr.msk.f32.gmra.mrb[6].mxu0 %vm2190_vm12, %v2149_v59  ;;  %2071 = vrot.lane.b32.xlu1 %v1978_v52, %s2860_s21 }
 0x269   : > { %1463 = vrot.lane.b32.xlu0 %v1962_v44, %s2857_s30 }
 0x26a   : > { %v1676_v34 = vpop.permute.xlu1 %1675  ;;  %v2165_v29 = vld [vmem:[#allocation3 + $0xb8] sm:$0xff] }
 0x26b   : > { %v1646_v39 = vpop.permute.xlu0 %1645  ;;  %1748 = vst.msk [vmem:[#allocation3 + $0xc0] sm:$0xff] %vm1723_vm9, %v1676_v34  ;;  %2785 = vmatmul.mubr.msk.f32.gmra.mrb[6].mxu1 %vm2190_vm12, %v2165_v29 }
 0x26c   : > { %1733 = vst.msk [vmem:[#allocation3 + $0x48] sm:$0xff] %vm1723_vm9, %v1646_v39  ;;  %1495 = vrot.lane.b32.xlu1 %v1978_v52, %s2857_s30  ;;  %v3957_v39 = vld [vmem:[%s4102_s3] ss:$0 sm:$0xff] }
 0x26d   : > { %1655 = vrot.lane.b32.xlu0 %v1577_v35, %s2858_s5 }
 0x26e   : > { %v1678_v1 = vpop.permute.xlu1 %1677 }
 0x26f   : > { %v1837_v53 = vpop.permute.xlu0 %1836  ;;  %1749 = vst.msk [vmem:[#allocation3 + $0xc8] sm:$0xff] %vm1723_vm9, %v1678_v1 }
 0x270   : > { %1925 = vst.msk [vmem:[#allocation3 + $0x40] sm:$0xff] %vm1916_vm10, %v1837_v53  ;;  %1687 = vrot.lane.b32.xlu1 %v1593_v6, %s2858_s5 }
 0x271   : > { %1657 = vrot.lane.b32.xlu0 %v1578_v47, %s2858_s5 }
 0x272   : > { %v1869_v3 = vpop.permute.xlu1 %1868 }
 0x273   : > { %v1261_v12 = vpop.permute.xlu0 %1260  ;;  %1941 = vst.msk [vmem:[#allocation3 + $0xc0] sm:$0xff] %vm1916_vm10, %v1869_v3 }
 0x274   : > { %1347 = vst.msk [vmem:[#allocation3 + $0x50] sm:$0xff] %vm1336_vm7, %v1261_v12  ;;  %1689 = vrot.lane.b32.xlu1 %v1594_v45, %s2858_s5 }
 0x275   : > { %1848 = vrot.lane.b32.xlu0 %v1770_v48, %s2859_s6 }
 0x276   : > { %v1293_v50 = vpop.permute.xlu1 %1292 }
 0x277   : > { %v1839_v27 = vpop.permute.xlu0 %1838  ;;  %1363 = vst.msk [vmem:[#allocation3 + $0xd0] sm:$0xff] %vm1336_vm7, %v1293_v50 }
 0x278   : > { %1926 = vst.msk [vmem:[#allocation3 + $0x48] sm:$0xff] %vm1916_vm10, %v1839_v27  ;;  %1880 = vrot.lane.b32.xlu1 %v1786_v26, %s2859_s6 }
 0x279   : > { %1850 = vrot.lane.b32.xlu0 %v1771_v10, %s2859_s6 }
 0x27a   : > { %v1871_v18 = vpop.permute.xlu1 %1870 }
 0x27b   : > { %v2030_v60 = vpop.permute.xlu0 %2029  ;;  %1942 = vst.msk [vmem:[#allocation3 + $0xc8] sm:$0xff] %vm1916_vm10, %v1871_v18 }
 0x27c   : > { %2118 = vst.msk [vmem:[#allocation3 + $0x40] sm:$0xff] %vm2109_vm11, %v2030_v60  ;;  %1882 = vrot.lane.b32.xlu1 %v1787_v11, %s2859_s6  ;;  %s3965_s6 = scalar_lea.vmem %s4103_s4, %s2958_s18 }
 0x27d   : > { %2041 = vrot.lane.b32.xlu0 %v1963_v0, %s2860_s21 }
 0x27e   : > { %v2062_v8 = vpop.permute.xlu1 %2061 }
 0x27f   : > { %v1263_v61 = vpop.permute.xlu0 %1262  ;;  %2134 = vst.msk [vmem:[#allocation3 + $0xc0] sm:$0xff] %vm2109_vm11, %v2062_v8 }
 0x280   : > { %1348 = vst.msk [vmem:[#allocation3 + $0x58] sm:$0xff] %vm1336_vm7, %v1263_v61  ;;  %2073 = vrot.lane.b32.xlu1 %v1979_v55, %s2860_s21 }
 0x281   : > { %2043 = vrot.lane.b32.xlu0 %v1964_v41, %s2860_s21 }
 0x282   : > { %v1295_v22 = vpop.permute.xlu1 %1294 }
 0x283   : > { %v1454_v4 = vpop.permute.xlu0 %1453  ;;  %v2150_v13 = vld [vmem:[#allocation3 + $0x40] sm:$0xff]  ;;  %1364 = vst.msk [vmem:[#allocation3 + $0xd8] sm:$0xff] %vm1336_vm7, %v1295_v22 }
 0x284   : > { %1540 = vst.msk [vmem:[#allocation3 + $0x50] sm:$0xff] %vm1529_vm8, %v1454_v4  ;;  %2763 = vmatprep.mubr.msk.f32.mxu0 %vm2190_vm12, %v2150_v13  ;;  %2075 = vrot.lane.b32.xlu1 %v1980_v15, %s2860_s21 }
 0x286   : > { %v1486_v7 = vpop.permute.xlu1 %1485  ;;  %v2166_v46 = vld [vmem:[#allocation3 + $0xc0] sm:$0xff] }
 0x287   : > { %v2032_v49 = vpop.permute.xlu0 %2031  ;;  %1556 = vst.msk [vmem:[#allocation3 + $0xd0] sm:$0xff] %vm1529_vm8, %v1486_v7  ;;  %2787 = vmatprep.mubr.msk.f32.mxu1 %vm2190_vm12, %v2166_v46 }
 0x288   : > { %2119 = vst.msk [vmem:[#allocation3 + $0x48] sm:$0xff] %vm2109_vm11, %v2032_v49 }
 0x28a   : > { %v2064_v9 = vpop.permute.xlu1 %2063 }
 0x28b   : > { %v1456_v51 = vpop.permute.xlu0 %1455  ;;  %2135 = vst.msk [vmem:[#allocation3 + $0xc8] sm:$0xff] %vm2109_vm11, %v2064_v9 }
 0x28c   : > { %1541 = vst.msk [vmem:[#allocation3 + $0x58] sm:$0xff] %vm1529_vm8, %v1456_v51 }
 0x28e   : > { %v1488_v54 = vpop.permute.xlu1 %1487 }
 0x28f   : > { %v1648_v42 = vpop.permute.xlu0 %1647  ;;  %v2151_v32 = vld [vmem:[#allocation3 + $0x48] sm:$0xff]  ;;  %1557 = vst.msk [vmem:[#allocation3 + $0xd8] sm:$0xff] %vm1529_vm8, %v1488_v54 }
 0x290   : > { %1734 = vst.msk [vmem:[#allocation3 + $0x50] sm:$0xff] %vm1723_vm9, %v1648_v42  ;;  %2764 = vmatmul.mubr.msk.f32.gmra.mrb[8].mxu0 %vm2190_vm12, %v2151_v32 }
 0x292   : > { %v1680_v5 = vpop.permute.xlu1 %1679  ;;  %v2167_v24 = vld [vmem:[#allocation3 + $0xc8] sm:$0xff] }
 0x293   : > { %v1650_v43 = vpop.permute.xlu0 %1649  ;;  %1750 = vst.msk [vmem:[#allocation3 + $0xd0] sm:$0xff] %vm1723_vm9, %v1680_v5  ;;  %2788 = vmatmul.mubr.msk.f32.gmra.mrb[8].mxu1 %vm2190_vm12, %v2167_v24 }
 0x294   : > { %1735 = vst.msk [vmem:[#allocation3 + $0x58] sm:$0xff] %vm1723_vm9, %v1650_v43 }
 0x296   : > { %v1682_v33 = vpop.permute.xlu1 %1681 }
 0x297   : > { %v1841_v56 = vpop.permute.xlu0 %1840  ;;  %1751 = vst.msk [vmem:[#allocation3 + $0xd8] sm:$0xff] %vm1723_vm9, %v1682_v33 }
 0x298   : > { %1927 = vst.msk [vmem:[#allocation3 + $0x50] sm:$0xff] %vm1916_vm10, %v1841_v56 }
 0x29a   : > { %v1873_v25 = vpop.permute.xlu1 %1872 }
 0x29b   : > { %v1265_v57 = vpop.permute.xlu0 %1264  ;;  %1943 = vst.msk [vmem:[#allocation3 + $0xd0] sm:$0xff] %vm1916_vm10, %v1873_v25 }
 0x29c   : > { %1349 = vst.msk [vmem:[#allocation3 + $0x60] sm:$0xff] %vm1336_vm7, %v1265_v57 }
 0x29e   : > { %v1297_v62 = vpop.permute.xlu1 %1296 }
 0x29f   : > { %v1843_v63 = vpop.permute.xlu0 %1842  ;;  %1365 = vst.msk [vmem:[#allocation3 + $0xe0] sm:$0xff] %vm1336_vm7, %v1297_v62 }
 0x2a0   : > { %1928 = vst.msk [vmem:[#allocation3 + $0x58] sm:$0xff] %vm1916_vm10, %v1843_v63 }
 0x2a2   : > { %v1875_v16 = vpop.permute.xlu1 %1874 }
 0x2a3   : > { %v2034_v14 = vpop.permute.xlu0 %2033  ;;  %1944 = vst.msk [vmem:[#allocation3 + $0xd8] sm:$0xff] %vm1916_vm10, %v1875_v16 }
 0x2a4   : > { %2120 = vst.msk [vmem:[#allocation3 + $0x50] sm:$0xff] %vm2109_vm11, %v2034_v14 }
 0x2a6   : > { %v2066_v30 = vpop.permute.xlu1 %2065 }
 0x2a7   : > { %v1267_v21 = vpop.permute.xlu0 %1266  ;;  %2136 = vst.msk [vmem:[#allocation3 + $0xd0] sm:$0xff] %vm2109_vm11, %v2066_v30 }
 0x2a8   : > { %1350 = vst.msk [vmem:[#allocation3 + $0x68] sm:$0xff] %vm1336_vm7, %v1267_v21 }
 0x2aa   : > { %v1299_v31 = vpop.permute.xlu1 %1298 }
 0x2ab   : > { %v1458_v17 = vpop.permute.xlu0 %1457  ;;  %v2152_v2 = vld [vmem:[#allocation3 + $0x50] sm:$0xff]  ;;  %1366 = vst.msk [vmem:[#allocation3 + $0xe8] sm:$0xff] %vm1336_vm7, %v1299_v31 }
 0x2ac   : > { %1542 = vst.msk [vmem:[#allocation3 + $0x60] sm:$0xff] %vm1529_vm8, %v1458_v17  ;;  %2766 = vmatprep.mubr.msk.f32.mxu0 %vm2190_vm12, %v2152_v2 }
 0x2ae   : > { %v1490_v36 = vpop.permute.xlu1 %1489  ;;  %v2168_v40 = vld [vmem:[#allocation3 + $0xd0] sm:$0xff] }
 0x2af   : > { %v2036_v37 = vpop.permute.xlu0 %2035  ;;  %1558 = vst.msk [vmem:[#allocation3 + $0xe0] sm:$0xff] %vm1529_vm8, %v1490_v36  ;;  %2790 = vmatprep.mubr.msk.f32.mxu1 %vm2190_vm12, %v2168_v40 }
 0x2b0   : > { %2121 = vst.msk [vmem:[#allocation3 + $0x58] sm:$0xff] %vm2109_vm11, %v2036_v37 }
 0x2b2   : > { %v2068_v19 = vpop.permute.xlu1 %2067 }
 0x2b3   : > { %v1460_v23 = vpop.permute.xlu0 %1459  ;;  %2137 = vst.msk [vmem:[#allocation3 + $0xd8] sm:$0xff] %vm2109_vm11, %v2068_v19 }
 0x2b4   : > { %1543 = vst.msk [vmem:[#allocation3 + $0x68] sm:$0xff] %vm1529_vm8, %v1460_v23 }
 0x2b6   : > { %v1492_v58 = vpop.permute.xlu1 %1491 }
 0x2b7   : > { %v1652_v28 = vpop.permute.xlu0 %1651  ;;  %v2153_v44 = vld [vmem:[#allocation3 + $0x58] sm:$0xff]  ;;  %1559 = vst.msk [vmem:[#allocation3 + $0xe8] sm:$0xff] %vm1529_vm8, %v1492_v58 }
 0x2b8   : > { %1736 = vst.msk [vmem:[#allocation3 + $0x60] sm:$0xff] %vm1723_vm9, %v1652_v28  ;;  %2767 = vmatmul.mubr.msk.f32.gmra.mrb[10].mxu0 %vm2190_vm12, %v2153_v44 }
 0x2ba   : > { %v1684_v20 = vpop.permute.xlu1 %1683  ;;  %v2169_v59 = vld [vmem:[#allocation3 + $0xd8] sm:$0xff] }
 0x2bb   : > { %v1654_v38 = vpop.permute.xlu0 %1653  ;;  %1752 = vst.msk [vmem:[#allocation3 + $0xe0] sm:$0xff] %vm1723_vm9, %v1684_v20  ;;  %2791 = vmatmul.mubr.msk.f32.gmra.mrb[10].mxu1 %vm2190_vm12, %v2169_v59 }
 0x2bc   : > { %1737 = vst.msk [vmem:[#allocation3 + $0x68] sm:$0xff] %vm1723_vm9, %v1654_v38 }
 0x2be   : > { %v1686_v52 = vpop.permute.xlu1 %1685 }
 0x2bf   : > { %v1845_v34 = vpop.permute.xlu0 %1844  ;;  %1753 = vst.msk [vmem:[#allocation3 + $0xe8] sm:$0xff] %vm1723_vm9, %v1686_v52 }
 0x2c0   : > { %1929 = vst.msk [vmem:[#allocation3 + $0x60] sm:$0xff] %vm1916_vm10, %v1845_v34 }
 0x2c2   : > { %v1877_v29 = vpop.permute.xlu1 %1876 }
 0x2c3   : > { %v2753_v35 = vpop.f32.mrb[0].mxu0  ;;  %1945 = vst.msk [vmem:[#allocation3 + $0xe0] sm:$0xff] %vm1916_vm10, %v1877_v29  ;;  %v1269_v1 = vpop.permute.xlu0 %1268 }
 0x2c4   : > { %v2359_v6 = vadd.f32 %v2753_v35, %v3957_v39  ;;  %v2353_v53 = vpop.f32.mrb[1].mxu0  ;;  %1351 = vst.msk [vmem:[#allocation3 + $0x70] sm:$0xff] %vm1336_vm7, %v1269_v1 }
 0x2c5   : > { %v2354_v47 = vadd.f32 %v3957_v39, %v2353_v53 }
 0x2c6   : > { %v2513_v45 = vmax.f32 %v2359_v6, 0.0  ;;  %v1301_v12 = vpop.permute.xlu1 %1300  ;;  %v2777_v48 = vpop.f32.mrb[0].mxu1 }
 0x2c7   : > { %v2512_v3 = vmax.f32 %v2354_v47, 0.0  ;;  %1367 = vst.msk [vmem:[#allocation3 + $0xf0] sm:$0xff] %vm1336_vm7, %v1301_v12  ;;  %v2439_v26 = vadd.f32 %v2777_v48, %v3957_v39  ;;  %v1847_v50 = vpop.permute.xlu0 %1846  ;;  %v2433_v27 = vpop.f32.mrb[1].mxu1 }
 0x2c8   : > { %2545 = vst.msk [vmem:[%s3965_s6 + $0x8] sm:$0xff] %vm307_vm2, %v2513_v45  ;;  %v2434_v10 = vadd.f32 %v3957_v39, %v2433_v27 }
 0x2c9   : > { %2544 = vst.msk [vmem:[%s3965_s6] sm:$0xff] %vm307_vm2, %v2512_v3  ;;  %v2529_v11 = vmax.f32 %v2439_v26, 0.0 }
 0x2ca   : > { %1930 = vst.msk [vmem:[#allocation3 + $0x68] sm:$0xff] %vm1916_vm10, %v1847_v50  ;;  %v2528_v18 = vmax.f32 %v2434_v10, 0.0  ;;  %v1879_v60 = vpop.permute.xlu1 %1878 }
 0x2cb   : > { %2561 = vst.msk [vmem:[%s3965_s6 + $0x88] sm:$0xff] %vm307_vm2, %v2529_v11  ;;  %v2038_v0 = vpop.permute.xlu0 %2037 }
 0x2cc   : > { %1946 = vst.msk [vmem:[#allocation3 + $0xe8] sm:$0xff] %vm1916_vm10, %v1879_v60 }
 0x2cd   : > { %2560 = vst.msk [vmem:[%s3965_s6 + $0x80] sm:$0xff] %vm307_vm2, %v2528_v18 }
 0x2ce   : > { %2122 = vst.msk [vmem:[#allocation3 + $0x60] sm:$0xff] %vm2109_vm11, %v2038_v0  ;;  %v2070_v55 = vpop.permute.xlu1 %2069 }
 0x2cf   : > { %2138 = vst.msk [vmem:[#allocation3 + $0xe0] sm:$0xff] %vm2109_vm11, %v2070_v55  ;;  %v1271_v8 = vpop.permute.xlu0 %1270 }
 0x2d0   : > { %1352 = vst.msk [vmem:[#allocation3 + $0x78] sm:$0xff] %vm1336_vm7, %v1271_v8 }
 0x2d2   : > { %v1303_v61 = vpop.permute.xlu1 %1302 }
 0x2d3   : > { %1368 = vst.msk [vmem:[#allocation3 + $0xf8] sm:$0xff] %vm1336_vm7, %v1303_v61  ;;  %v1462_v41 = vpop.permute.xlu0 %1461 }
 0x2d4   : > { %1544 = vst.msk [vmem:[#allocation3 + $0x70] sm:$0xff] %vm1529_vm8, %v1462_v41 }
 0x2d5   : > { %v2154_v15 = vld [vmem:[#allocation3 + $0x60] sm:$0xff] }
 0x2d6   : > { %2769 = vmatprep.mubr.msk.f32.mxu0 %vm2190_vm12, %v2154_v15  ;;  %v1494_v22 = vpop.permute.xlu1 %1493  ;;  %v2170_v4 = vld [vmem:[#allocation3 + $0xe0] sm:$0xff] }
 0x2d7   : > { %1560 = vst.msk [vmem:[#allocation3 + $0xf0] sm:$0xff] %vm1529_vm8, %v1494_v22  ;;  %v2040_v13 = vpop.permute.xlu0 %2039  ;;  %2793 = vmatprep.mubr.msk.f32.mxu1 %vm2190_vm12, %v2170_v4 }
 0x2d8   : > { %2123 = vst.msk [vmem:[#allocation3 + $0x68] sm:$0xff] %vm2109_vm11, %v2040_v13 }
 0x2da   : > { %v2072_v7 = vpop.permute.xlu1 %2071 }
 0x2db   : > { %2139 = vst.msk [vmem:[#allocation3 + $0xe8] sm:$0xff] %vm2109_vm11, %v2072_v7  ;;  %v1464_v49 = vpop.permute.xlu0 %1463 }
 0x2dc   : > { %1545 = vst.msk [vmem:[#allocation3 + $0x78] sm:$0xff] %vm1529_vm8, %v1464_v49 }
 0x2de   : > { %v1496_v46 = vpop.permute.xlu1 %1495 }
 0x2df   : > { %1561 = vst.msk [vmem:[#allocation3 + $0xf8] sm:$0xff] %vm1529_vm8, %v1496_v46  ;;  %v1656_v9 = vpop.permute.xlu0 %1655  ;;  %v2155_v51 = vld [vmem:[#allocation3 + $0x68] sm:$0xff] }
 0x2e0   : > { %1738 = vst.msk [vmem:[#allocation3 + $0x70] sm:$0xff] %vm1723_vm9, %v1656_v9  ;;  %2770 = vmatmul.mubr.msk.f32.gmra.mrb[12].mxu0 %vm2190_vm12, %v2155_v51 }
 0x2e2   : > { %v1688_v54 = vpop.permute.xlu1 %1687  ;;  %v2171_v42 = vld [vmem:[#allocation3 + $0xe8] sm:$0xff] }
 0x2e3   : > { %1754 = vst.msk [vmem:[#allocation3 + $0xf0] sm:$0xff] %vm1723_vm9, %v1688_v54  ;;  %v1658_v32 = vpop.permute.xlu0 %1657  ;;  %2794 = vmatmul.mubr.msk.f32.gmra.mrb[12].mxu1 %vm2190_vm12, %v2171_v42 }
 0x2e4   : > { %1739 = vst.msk [vmem:[#allocation3 + $0x78] sm:$0xff] %vm1723_vm9, %v1658_v32 }
 0x2e6   : > { %v1690_v5 = vpop.permute.xlu1 %1689 }
 0x2e7   : > { %1755 = vst.msk [vmem:[#allocation3 + $0xf8] sm:$0xff] %vm1723_vm9, %v1690_v5  ;;  %v1849_v43 = vpop.permute.xlu0 %1848 }
 0x2e8   : > { %1931 = vst.msk [vmem:[#allocation3 + $0x70] sm:$0xff] %vm1916_vm10, %v1849_v43 }
 0x2ea   : > { %v1881_v24 = vpop.permute.xlu1 %1880 }
 0x2eb   : > { %v2756_v33 = vpop.f32.mrb[2].mxu0  ;;  %1947 = vst.msk [vmem:[#allocation3 + $0xf0] sm:$0xff] %vm1916_vm10, %v1881_v24  ;;  %v1851_v56 = vpop.permute.xlu0 %1850 }
 0x2ec   : > { %v2369_v25 = vadd.f32 %v2756_v33, %v3957_v39  ;;  %v2363_v57 = vpop.f32.mrb[3].mxu0  ;;  %1932 = vst.msk [vmem:[#allocation3 + $0x78] sm:$0xff] %vm1916_vm10, %v1851_v56 }
 0x2ed   : > { %v2364_v62 = vadd.f32 %v3957_v39, %v2363_v57 }
 0x2ee   : > { %v2515_v63 = vmax.f32 %v2369_v25, 0.0  ;;  %v1883_v14 = vpop.permute.xlu1 %1882  ;;  %v2780_v30 = vpop.f32.mrb[2].mxu1 }
 0x2ef   : > { %v2514_v16 = vmax.f32 %v2364_v62, 0.0  ;;  %1948 = vst.msk [vmem:[#allocation3 + $0xf8] sm:$0xff] %vm1916_vm10, %v1883_v14  ;;  %v2449_v21 = vadd.f32 %v2780_v30, %v3957_v39  ;;  %v2042_v31 = vpop.permute.xlu0 %2041  ;;  %v2443_v17 = vpop.f32.mrb[3].mxu1 }
 0x2f0   : > { %2547 = vst.msk [vmem:[%s3965_s6 + $0x18] sm:$0xff] %vm307_vm2, %v2515_v63  ;;  %v2444_v2 = vadd.f32 %v3957_v39, %v2443_v17 }
 0x2f1   : > { %2546 = vst.msk [vmem:[%s3965_s6 + $0x10] sm:$0xff] %vm307_vm2, %v2514_v16  ;;  %v2531_v36 = vmax.f32 %v2449_v21, 0.0 }
 0x2f2   : > { %2124 = vst.msk [vmem:[#allocation3 + $0x70] sm:$0xff] %vm2109_vm11, %v2042_v31  ;;  %v2530_v37 = vmax.f32 %v2444_v2, 0.0  ;;  %v2074_v40 = vpop.permute.xlu1 %2073 }
 0x2f3   : > { %2563 = vst.msk [vmem:[%s3965_s6 + $0x98] sm:$0xff] %vm307_vm2, %v2531_v36  ;;  %v2044_v19 = vpop.permute.xlu0 %2043 }
 0x2f4   : > { %2140 = vst.msk [vmem:[#allocation3 + $0xf0] sm:$0xff] %vm2109_vm11, %v2074_v40  ;;  %2125 = vst.msk [vmem:[#allocation3 + $0x78] sm:$0xff] %vm2109_vm11, %v2044_v19 }
 0x2f5   : > { %2562 = vst.msk [vmem:[%s3965_s6 + $0x90] sm:$0xff] %vm307_vm2, %v2530_v37 }
 0x2f6   : > { %v2076_v23 = vpop.permute.xlu1 %2075 }
 0x2f7   : > { %2141 = vst.msk [vmem:[#allocation3 + $0xf8] sm:$0xff] %vm2109_vm11, %v2076_v23 }
 0x2f9   : > { %v2156_v58 = vld [vmem:[#allocation3 + $0x70] sm:$0xff] }
 0x2fa   : > { %2772 = vmatprep.mubr.msk.f32.mxu0 %vm2190_vm12, %v2156_v58 }
 0x2fb   : > { %v2172_v28 = vld [vmem:[#allocation3 + $0xf0] sm:$0xff]  ;;  %v2157_v44 = vld [vmem:[#allocation3 + $0x78] sm:$0xff] }
 0x2fc   : > { %2796 = vmatprep.mubr.msk.f32.mxu1 %vm2190_vm12, %v2172_v28  ;;  %2773 = vmatmul.mubr.msk.f32.gmra.mrb[14].mxu0 %vm2190_vm12, %v2157_v44 }
 0x2fe   : > { %v2173_v20 = vld [vmem:[#allocation3 + $0xf8] sm:$0xff] }
 0x2ff   : > { %2797 = vmatmul.mubr.msk.f32.gmra.mrb[14].mxu1 %vm2190_vm12, %v2173_v20 }
 0x313   : > { %v2759_v38 = vpop.f32.mrb[4].mxu0 }
 0x314   : > { %v2379_v59 = vadd.f32 %v2759_v38, %v3957_v39  ;;  %v2373_v52 = vpop.f32.mrb[5].mxu0 }
 0x315   : > { %v2374_v34 = vadd.f32 %v3957_v39, %v2373_v52 }
 0x316   : > { %v2517_v29 = vmax.f32 %v2379_v59, 0.0  ;;  %v2783_v6 = vpop.f32.mrb[4].mxu1 }
 0x317   : > { %v2516_v35 = vmax.f32 %v2374_v34, 0.0  ;;  %v2459_v1 = vadd.f32 %v2783_v6, %v3957_v39  ;;  %v2453_v53 = vpop.f32.mrb[5].mxu1 }
 0x318   : > { %2549 = vst.msk [vmem:[%s3965_s6 + $0x28] sm:$0xff] %vm307_vm2, %v2517_v29  ;;  %v2454_v47 = vadd.f32 %v3957_v39, %v2453_v53 }
 0x319   : > { %2548 = vst.msk [vmem:[%s3965_s6 + $0x20] sm:$0xff] %vm307_vm2, %v2516_v35  ;;  %v2533_v45 = vmax.f32 %v2459_v1, 0.0 }
 0x31a   : > { %v2532_v3 = vmax.f32 %v2454_v47, 0.0 }
 0x31b   : > { %2565 = vst.msk [vmem:[%s3965_s6 + $0xa8] sm:$0xff] %vm307_vm2, %v2533_v45 }
 0x31c   : > { %2564 = vst.msk [vmem:[%s3965_s6 + $0xa0] sm:$0xff] %vm307_vm2, %v2532_v3 }
 0x33b   : > { %v2762_v12 = vpop.f32.mrb[6].mxu0 }
 0x33c   : > { %v2389_v48 = vadd.f32 %v2762_v12, %v3957_v39  ;;  %v2383_v26 = vpop.f32.mrb[7].mxu0 }
 0x33d   : > { %v2384_v50 = vadd.f32 %v3957_v39, %v2383_v26 }
 0x33e   : > { %v2519_v27 = vmax.f32 %v2389_v48, 0.0  ;;  %v2786_v11 = vpop.f32.mrb[6].mxu1 }
 0x33f   : > { %v2518_v10 = vmax.f32 %v2384_v50, 0.0  ;;  %v2469_v18 = vadd.f32 %v2786_v11, %v3957_v39  ;;  %v2463_v60 = vpop.f32.mrb[7].mxu1 }
 0x340   : > { %2551 = vst.msk [vmem:[%s3965_s6 + $0x38] sm:$0xff] %vm307_vm2, %v2519_v27  ;;  %v2464_v0 = vadd.f32 %v3957_v39, %v2463_v60 }
 0x341   : > { %2550 = vst.msk [vmem:[%s3965_s6 + $0x30] sm:$0xff] %vm307_vm2, %v2518_v10  ;;  %v2535_v55 = vmax.f32 %v2469_v18, 0.0 }
 0x342   : > { %v2534_v8 = vmax.f32 %v2464_v0, 0.0 }
 0x343   : > { %2567 = vst.msk [vmem:[%s3965_s6 + $0xb8] sm:$0xff] %vm307_vm2, %v2535_v55 }
 0x344   : > { %2566 = vst.msk [vmem:[%s3965_s6 + $0xb0] sm:$0xff] %vm307_vm2, %v2534_v8 }
 0x363   : > { %v2765_v61 = vpop.f32.mrb[8].mxu0 }
 0x364   : > { %v2399_v41 = vadd.f32 %v2765_v61, %v3957_v39  ;;  %v2393_v15 = vpop.f32.mrb[9].mxu0 }
 0x365   : > { %v2394_v22 = vadd.f32 %v3957_v39, %v2393_v15 }
 0x366   : > { %v2521_v4 = vmax.f32 %v2399_v41, 0.0  ;;  %v2789_v7 = vpop.f32.mrb[8].mxu1 }
 0x367   : > { %v2520_v13 = vmax.f32 %v2394_v22, 0.0  ;;  %v2479_v49 = vadd.f32 %v2789_v7, %v3957_v39  ;;  %v2473_v46 = vpop.f32.mrb[9].mxu1 }
 0x368   : > { %2553 = vst.msk [vmem:[%s3965_s6 + $0x48] sm:$0xff] %vm307_vm2, %v2521_v4  ;;  %v2474_v9 = vadd.f32 %v3957_v39, %v2473_v46 }
 0x369   : > { %2552 = vst.msk [vmem:[%s3965_s6 + $0x40] sm:$0xff] %vm307_vm2, %v2520_v13  ;;  %v2537_v51 = vmax.f32 %v2479_v49, 0.0 }
 0x36a   : > { %v2536_v54 = vmax.f32 %v2474_v9, 0.0 }
 0x36b   : > { %2569 = vst.msk [vmem:[%s3965_s6 + $0xc8] sm:$0xff] %vm307_vm2, %v2537_v51 }
 0x36c   : > { %2568 = vst.msk [vmem:[%s3965_s6 + $0xc0] sm:$0xff] %vm307_vm2, %v2536_v54 }
 0x38b   : > { %v2768_v42 = vpop.f32.mrb[10].mxu0 }
 0x38c   : > { %v2409_v32 = vadd.f32 %v2768_v42, %v3957_v39  ;;  %v2403_v5 = vpop.f32.mrb[11].mxu0 }
 0x38d   : > { %v2404_v43 = vadd.f32 %v3957_v39, %v2403_v5 }
 0x38e   : > { %v2523_v24 = vmax.f32 %v2409_v32, 0.0  ;;  %v2792_v56 = vpop.f32.mrb[10].mxu1 }
 0x38f   : > { %v2522_v33 = vmax.f32 %v2404_v43, 0.0  ;;  %v2489_v25 = vadd.f32 %v2792_v56, %v3957_v39  ;;  %v2483_v57 = vpop.f32.mrb[11].mxu1 }
 0x390   : > { %2555 = vst.msk [vmem:[%s3965_s6 + $0x58] sm:$0xff] %vm307_vm2, %v2523_v24  ;;  %v2484_v62 = vadd.f32 %v3957_v39, %v2483_v57 }
 0x391   : > { %2554 = vst.msk [vmem:[%s3965_s6 + $0x50] sm:$0xff] %vm307_vm2, %v2522_v33  ;;  %v2539_v63 = vmax.f32 %v2489_v25, 0.0 }
 0x392   : > { %v2538_v16 = vmax.f32 %v2484_v62, 0.0 }
 0x393   : > { %2571 = vst.msk [vmem:[%s3965_s6 + $0xd8] sm:$0xff] %vm307_vm2, %v2539_v63 }
 0x394   : > { %2570 = vst.msk [vmem:[%s3965_s6 + $0xd0] sm:$0xff] %vm307_vm2, %v2538_v16 }
 0x3b3   : > { %v2771_v14 = vpop.f32.mrb[12].mxu0 }
 0x3b4   : > { %v2419_v30 = vadd.f32 %v2771_v14, %v3957_v39  ;;  %v2413_v21 = vpop.f32.mrb[13].mxu0 }
 0x3b5   : > { %v2414_v31 = vadd.f32 %v3957_v39, %v2413_v21 }
 0x3b6   : > { %v2525_v17 = vmax.f32 %v2419_v30, 0.0  ;;  %v2795_v2 = vpop.f32.mrb[12].mxu1 }
 0x3b7   : > { %v2524_v36 = vmax.f32 %v2414_v31, 0.0  ;;  %v2499_v37 = vadd.f32 %v2795_v2, %v3957_v39  ;;  %v2493_v40 = vpop.f32.mrb[13].mxu1 }
 0x3b8   : > { %2557 = vst.msk [vmem:[%s3965_s6 + $0x68] sm:$0xff] %vm307_vm2, %v2525_v17  ;;  %v2494_v19 = vadd.f32 %v3957_v39, %v2493_v40 }
 0x3b9   : > { %2556 = vst.msk [vmem:[%s3965_s6 + $0x60] sm:$0xff] %vm307_vm2, %v2524_v36  ;;  %v2541_v23 = vmax.f32 %v2499_v37, 0.0 }
 0x3ba   : > { %v2540_v58 = vmax.f32 %v2494_v19, 0.0 }
 0x3bb   : > { %2573 = vst.msk [vmem:[%s3965_s6 + $0xe8] sm:$0xff] %vm307_vm2, %v2541_v23 }
 0x3bc   : > { %2572 = vst.msk [vmem:[%s3965_s6 + $0xe0] sm:$0xff] %vm307_vm2, %v2540_v58 }
 0x3cf   : > { %v2774_v28 = vpop.f32.mrb[14].mxu0 }
 0x3d0   : > { %v2429_v44 = vadd.f32 %v2774_v28, %v3957_v39  ;;  %v2423_v20 = vpop.f32.mrb[15].mxu0 }
 0x3d1   : > { %v2424_v38 = vadd.f32 %v3957_v39, %v2423_v20 }
 0x3d2   : > { %v2527_v59 = vmax.f32 %v2429_v44, 0.0  ;;  %v2798_v52 = vpop.f32.mrb[14].mxu1 }
 0x3d3   : > { %v2526_v34 = vmax.f32 %v2424_v38, 0.0  ;;  %v2509_v29 = vadd.f32 %v2798_v52, %v3957_v39  ;;  %v2503_v35 = vpop.f32.mrb[15].mxu1 }
 0x3d4   : > { %2559 = vst.msk [vmem:[%s3965_s6 + $0x78] sm:$0xff] %vm307_vm2, %v2527_v59  ;;  %v2504_v6 = vadd.f32 %v3957_v39, %v2503_v35 }
 0x3d5   : > { %2558 = vst.msk [vmem:[%s3965_s6 + $0x70] sm:$0xff] %vm307_vm2, %v2526_v34  ;;  %v2543_v1 = vmax.f32 %v2509_v29, 0.0 }
 0x3d6   : > { %v2542_v53 = vmax.f32 %v2504_v6, 0.0 }
 0x3d7   : > { %2575 = vst.msk [vmem:[%s3965_s6 + $0xf8] sm:$0xff] %vm307_vm2, %v2543_v1 }
 0x3d8   : > { %2574 = vst.msk [vmem:[%s3965_s6 + $0xf0] sm:$0xff] %vm307_vm2, %v2542_v53 }
 0x3d9 PF: > { %s14_s15 = sadd.s32 1, %s2849_s15  }
 0x3da   : > { %p11_p4 = scmp.ge.s32.totalorder %s14_s15, 4  }
 0x3dc   :  { %13 = sbr.rel (!%p11_p4) target bundleno = 1 (0x1), region = 71 }

</bundles_post_ra>
